<compile_context>
chip_gen: v6e
topology: v6e:2x2x1
jax: 0.10.0
libtpu: 0.0.40
codegen_flags: <defaults>
</compile_context>

<pallas_src>
import math

import jax
import jax.numpy as jnp
from jax.experimental import pallas as pl
from jax.experimental.pallas import tpu as pltpu


# --------------------------------------------------------------------------- #
# Kernel
# --------------------------------------------------------------------------- #
def _char_bilstm_kernel(ids_ref, len_ref, tf_ref, tb_ref, whh_ref, o_ref):
    """Fused bidirectional masked LSTM recurrence with in-kernel gather.

    ids_ref : (TN, L)      int32 char ids (padded rows hold 0)
    len_ref : (TN, 1)      int32 word lengths (padded rows hold 0)
    tf_ref  : (C_pad, 8h)  f32  projected-embedding table, bwd gate cols zeroed
    tb_ref  : (C_pad, 8h)  f32  projected-embedding table, fwd gate cols zeroed
    whh_ref : (2h, 8h)     bf16 block-diagonal recurrent weights
    o_ref   : (TN, 2h)     f32  output = [h_fwd_final | h_bwd_final]
    """
    TN, L = ids_ref.shape
    C_pad = tf_ref.shape[0]
    H2 = o_ref.shape[1]
    hid = H2 // 2

    # Tiny loop-invariant values (<= a couple of vregs) — safe to hoist.
    whh = whh_ref[...]                                            # (2h, 8h) bf16
    cls_iota = jax.lax.broadcasted_iota(jnp.int32, (1, C_pad), 1)  # char classes
    lane_iota = jax.lax.broadcasted_iota(jnp.int32, (1, H2), 1)
    is_fwd_lane = lane_iota < hid                                  # fwd half of state

    h = jnp.zeros((TN, H2), jnp.float32)
    c = jnp.zeros((TN, H2), jnp.float32)

    # L (word length) is small; static unroll keeps the serial recurrence
    # visible to the LLO scheduler.  Switch to lax.fori_loop for L >~ 16.
    for t in range(L):
        tr = L - 1 - t                                  # reversed step (bwd dir)

        # --- In-kernel gather of projected embeddings (review item 2) -------
        # one-hot(ids) @ table on the MXU; off the serial chain so it overlaps
        # the recurrent matmul.  table_f / table_b have the other direction's
        # columns zeroed, so the sum puts the fwd step-t row into the fwd gate
        # columns and the bwd step-(L-1-t) row into the bwd gate columns, with
        # the folded biases counted exactly once.  The tables are re-read from
        # VMEM per step (vld slots have slack) so their 32 vregs never sit in
        # a long live range.
        oh_f = (ids_ref[:, t:t + 1] == cls_iota).astype(jnp.float32)
        x = jnp.dot(oh_f, tf_ref[...], preferred_element_type=jnp.float32)
        oh_b = (ids_ref[:, tr:tr + 1] == cls_iota).astype(jnp.float32)
        x = x + jnp.dot(oh_b, tb_ref[...], preferred_element_type=jnp.float32)

        # --- Recurrent matmul: the serial critical chain, bf16 operands -----
        gates = x + jnp.dot(h.astype(jnp.bfloat16), whh,
                            preferred_element_type=jnp.float32)

        # Gate lanes: [i_f,i_b,f_f,f_b,o_f,o_b,g_f,g_b], each `hid` wide.
        s = jax.nn.sigmoid(gates[:, 0:6 * hid])         # i, f, o gates (96 lanes)
        i_g = s[:, 0 * H2:1 * H2]
        f_g = s[:, 1 * H2:2 * H2]
        o_g = s[:, 2 * H2:3 * H2]
        g_g = jnp.tanh(gates[:, 3 * H2:4 * H2])         # cell candidate
        c_new = f_g * c + i_g * g_g
        h_new = o_g * jnp.tanh(c_new)

        # --- Masked blend computed from lengths (review item 1) -------------
        # fwd lanes are active iff t < len, bwd lanes iff (L-1-t) < len.
        t_eff = jnp.where(is_fwd_lane, t, tr)           # (1, 2h) int32
        m = t_eff < len_ref[...]                        # (TN, 2h) bool
        h = jnp.where(m, h_new, h)
        c = jnp.where(m, c_new, c)

    o_ref[...] = h


# --------------------------------------------------------------------------- #
# Weight / input rearrangement helpers (wrapper-side, plain JAX)
# --------------------------------------------------------------------------- #
# PyTorch LSTM gate row order inside weight_ih / weight_hh is (i, f, g, o).
# Kernel column-block order (each block `hid` wide):
#   [i_f, i_b, f_f, f_b, o_f, o_b, g_f, g_b]
_GATE_ORDER = (0, 1, 3, 2)   # i, f, o, g  (in PyTorch row-block indices)


def _arrange_ih(w_f, w_b, hid):
    """w_f, w_b: (4h, D) PyTorch layout -> (D, 8h) interleaved column layout."""
    blk = lambda w, k: w[k * hid:(k + 1) * hid].T        # (D, h)
    cols = []
    for k in _GATE_ORDER:
        cols.append(blk(w_f, k))
        cols.append(blk(w_b, k))
    return jnp.concatenate(cols, axis=1)


def _arrange_bias(b_f, b_b, hid):
    blk = lambda b, k: b[k * hid:(k + 1) * hid]
    cols = []
    for k in _GATE_ORDER:
        cols.append(blk(b_f, k))
        cols.append(blk(b_b, k))
    return jnp.concatenate(cols, axis=0)                 # (8h,)


def _arrange_whh_blockdiag(whh_f, whh_b, hid):
    """whh_*: (4h, h) PyTorch layout -> (2h, 8h) block-diagonal fused layout."""
    zeros = jnp.zeros((hid, hid), jnp.float32)
    blk = lambda w, k: w[k * hid:(k + 1) * hid].T        # (h, h)
    top, bot = [], []
    for k in _GATE_ORDER:
        top.extend([blk(whh_f, k), zeros])               # fwd rows feed fwd cols
        bot.extend([zeros, blk(whh_b, k)])               # bwd rows feed bwd cols
    return jnp.concatenate(
        [jnp.concatenate(top, axis=1), jnp.concatenate(bot, axis=1)], axis=0)


def _round_up(x, m):
    return ((x + m - 1) // m) * m


# --------------------------------------------------------------------------- #
# Forward wrapper
# --------------------------------------------------------------------------- #
def char_bilstm_forward(char_seq_tensor, char_seq_len, params, *, tn=128):
    """Pallas-backed equivalent of CharBiLSTM.forward (eval mode)."""
    B, S, L = char_seq_tensor.shape
    N = B * S
    hid = params["whh_f"].shape[1]           # per-direction hidden size
    H = 2 * hid
    G8 = 8 * hid
    C = params["emb"].shape[0]
    C_pad = _round_up(C, 128)                # MXU-friendly one-hot contracting dim

    ids = char_seq_tensor.reshape(N, L).astype(jnp.int32)
    lens = char_seq_len.reshape(N, 1).astype(jnp.int32)

    # ---- Projected-embedding table: (C, 8h) = emb @ [Wih arranged] + biases.
    # Split into fwd-only / bwd-only column copies so the kernel combines the
    # two directions' time-reversed gathers with one add (bias counted once).
    w_ih = _arrange_ih(params["wih_f"], params["wih_b"], hid)          # (E, 8h)
    bias = _arrange_bias(params["bih_f"] + params["bhh_f"],
                         params["bih_b"] + params["bhh_b"], hid)       # (8h,)
    table = params["emb"].astype(jnp.float32) @ w_ih + bias            # (C, 8h)
    is_bwd_col = ((jnp.arange(G8) // hid) % 2 == 1)[None, :]           # odd blocks = bwd
    table_f = jnp.where(is_bwd_col, 0.0, table)
    table_b = jnp.where(is_bwd_col, table, 0.0)
    rpad = C_pad - C
    table_f = jnp.pad(table_f, ((0, rpad), (0, 0))).astype(jnp.float32)
    table_b = jnp.pad(table_b, ((0, rpad), (0, 0))).astype(jnp.float32)

    # ---- Recurrent weights: block-diagonal fused layout, bf16 MXU operands.
    whh_bd = _arrange_whh_blockdiag(
        params["whh_f"], params["whh_b"], hid).astype(jnp.bfloat16)

    # ---- Tile the word axis.  Ceiling is vreg pressure (h/c/one-hot/gates are
    # TN/8 vregs each), not VMEM; sweep tn in {128, 256} against spills in the
    # bundle dump.  Ensure >= 2 grid steps so the "parallel" axis can span both
    # v7x TensorCores (no-op on v5e/v6e).
    TN = min(tn, _round_up(N, 8))
    if N > 8 and _round_up(N, TN) // TN < 2:
        TN = max(8, _round_up((N + 1) // 2, 8))
    N_pad = _round_up(N, TN)
    pad = N_pad - N
    if pad:
        ids = jnp.pad(ids, ((0, pad), (0, 0)))      # char 0 (harmless, masked out)
        lens = jnp.pad(lens, ((0, pad), (0, 0)))    # len 0 -> state stays exactly 0

    out = pl.pallas_call(
        _char_bilstm_kernel,
        out_shape=jax.ShapeDtypeStruct((N_pad, H), jnp.float32),
        grid=(N_pad // TN,),
        in_specs=[
            pl.BlockSpec((TN, L), lambda i: (i, 0)),          # int32 ids (only stream)
            pl.BlockSpec((TN, 1), lambda i: (i, 0)),          # int32 lengths
            pl.BlockSpec((C_pad, G8), lambda i: (0, 0)),      # fwd table (VMEM resident)
            pl.BlockSpec((C_pad, G8), lambda i: (0, 0)),      # bwd table (VMEM resident)
            pl.BlockSpec((2 * hid, G8), lambda i: (0, 0)),    # block-diag Whh (resident)
        ],
        out_specs=pl.BlockSpec((TN, H), lambda i: (i, 0)),
        compiler_params=pltpu.CompilerParams(
            dimension_semantics=("parallel",)),
    )(ids, lens, table_f, table_b, whh_bd)

    return out[:N].reshape(B, S, H)


# --------------------------------------------------------------------------- #
# Pure-JAX reference (unfused, PyTorch layout) for verification
# --------------------------------------------------------------------------- #
def char_bilstm_reference(char_seq_tensor, char_seq_len, params):
    B, S, L = char_seq_tensor.shape
    N = B * S
    hid = params["whh_f"].shape[1]
    ids = char_seq_tensor.reshape(N, L)
    lens = char_seq_len.reshape(N)
    emb = params["emb"][ids].astype(jnp.float32)           # (N, L, E)
    mask = (jnp.arange(L)[None, :] < lens[:, None]).astype(jnp.float32)

    def cell(x_t, h, c, wih, whh, b):
        gates = x_t @ wih.T + h @ whh.T + b
        i = jax.nn.sigmoid(gates[:, 0 * hid:1 * hid])
        f = jax.nn.sigmoid(gates[:, 1 * hid:2 * hid])
        g = jnp.tanh(gates[:, 2 * hid:3 * hid])
        o = jax.nn.sigmoid(gates[:, 3 * hid:4 * hid])
        c_new = f * c + i * g
        return o * jnp.tanh(c_new), c_new

    b_f = params["bih_f"] + params["bhh_f"]
    b_b = params["bih_b"] + params["bhh_b"]

    h_f = jnp.zeros((N, hid), jnp.float32)
    c_f = jnp.zeros((N, hid), jnp.float32)
    for t in range(L):
        m = mask[:, t:t + 1]
        h_n, c_n = cell(emb[:, t], h_f, c_f, params["wih_f"], params["whh_f"], b_f)
        h_f = m * h_n + (1 - m) * h_f
        c_f = m * c_n + (1 - m) * c_f

    h_b = jnp.zeros((N, hid), jnp.float32)
    c_b = jnp.zeros((N, hid), jnp.float32)
    for t in range(L - 1, -1, -1):
        m = mask[:, t:t + 1]
        h_n, c_n = cell(emb[:, t], h_b, c_b, params["wih_b"], params["whh_b"], b_b)
        h_b = m * h_n + (1 - m) * h_b
        c_b = m * c_n + (1 - m) * c_b

    return jnp.concatenate([h_f, h_b], axis=-1).reshape(B, S, 2 * hid)


# --------------------------------------------------------------------------- #
if __name__ == "__main__":
    # Small config consistent with the module's __init__.
    B, S, L = 2, 4, 8           # batch, sent_len, word_length
    CHAR_SIZE = 30              # len(idx2char)
    E = 16                      # char_emb_size
    H = 32                      # charlstm_hidden_dim (bidirectional total)
    hid = H // 2                # per-direction hidden

    key = jax.random.PRNGKey(0)
    keys = jax.random.split(key, 12)
    bound = 1.0 / math.sqrt(hid)

    def unif(k, shape):
        return jax.random.uniform(k, shape, jnp.float32, minval=-bound, maxval=bound)

    params = {
        "emb":   jax.random.normal(keys[0], (CHAR_SIZE, E), jnp.float32),
        # PyTorch LSTM param shapes: weight_ih (4h, E), weight_hh (4h, h), biases (4h,)
        "wih_f": unif(keys[1], (4 * hid, E)),
        "whh_f": unif(keys[2], (4 * hid, hid)),
        "bih_f": unif(keys[3], (4 * hid,)),
        "bhh_f": unif(keys[4], (4 * hid,)),
        "wih_b": unif(keys[5], (4 * hid, E)),
        "whh_b": unif(keys[6], (4 * hid, hid)),
        "bih_b": unif(keys[7], (4 * hid,)),
        "bhh_b": unif(keys[8], (4 * hid,)),
    }

    char_seq_tensor = jax.random.randint(keys[9], (B, S, L), 0, CHAR_SIZE, jnp.int32)
    char_seq_len = jax.random.randint(keys[10], (B, S), 1, L + 1, jnp.int32)  # >=1

    out = char_bilstm_forward(char_seq_tensor, char_seq_len, params)
    out = jax.block_until_ready(out)

    ref = char_bilstm_reference(char_seq_tensor, char_seq_len, params)
    assert out.shape == (B, S, H), out.shape
    # Tolerance loosened vs the f32 reference because the recurrent h @ Whh
    # matmul runs with bf16 operands (f32 accumulation) per the perf review.
    assert jnp.allclose(out, ref, atol=2e-2, rtol=2e-2), float(jnp.abs(out - ref).max())

    print("KERNEL_OK")
</pallas_src>

<mosaic_0001>
module attributes {stable_mosaic.version = 11 : i64} {
  func.func @_char_bilstm_kernel(%arg0: i32, %arg1: memref<8x8xi32, #tpu.memory_space<vmem>>, %arg2: memref<8x1xi32, #tpu.memory_space<vmem>>, %arg3: memref<128x128xf32, #tpu.memory_space<vmem>>, %arg4: memref<128x128xf32, #tpu.memory_space<vmem>>, %arg5: memref<32x128xbf16, #tpu.memory_space<vmem>>, %arg6: memref<8x32xf32, #tpu.memory_space<vmem>>) attributes {dimension_semantics = [#tpu.dimension_semantics<parallel>], iteration_bounds = array<i64: 1>, scalar_prefetch = 0 : i64, scratch_operands = 0 : i64, tpu.core_type = #tpu.core_type<tc>, window_params = [{transform_indices = @transform_0, window_bounds = array<i64: 8, 8>}, {transform_indices = @transform_1, window_bounds = array<i64: 8, 1>}, {pipeline_mode = #tpu.pipeline_mode<synchronous>, transform_indices = @transform_2, window_bounds = array<i64: 128, 128>}, {pipeline_mode = #tpu.pipeline_mode<synchronous>, transform_indices = @transform_3, window_bounds = array<i64: 128, 128>}, {pipeline_mode = #tpu.pipeline_mode<synchronous>, transform_indices = @transform_4, window_bounds = array<i64: 32, 128>}, {transform_indices = @transform_5, window_bounds = array<i64: 8, 32>}]} {
    %c0 = arith.constant 0 : index
    %c0_0 = arith.constant 0 : index
    %0 = vector.load %arg5[%c0, %c0_0] : memref<32x128xbf16, #tpu.memory_space<vmem>>, vector<32x128xbf16>
    %1 = tpu.iota {dimensions = array<i32: 1>} : vector<1x128xi32>
    %2 = tpu.iota {dimensions = array<i32: 1>} : vector<1x32xi32>
    %c16_i32 = arith.constant 16 : i32
    %3 = vector.broadcast %c16_i32 : i32 to vector<1x32xi32>
    %4 = arith.cmpi slt, %2, %3 : vector<1x32xi32>
    %cst = arith.constant 0.000000e+00 : f32
    %5 = vector.broadcast %cst : f32 to vector<8x32xf32>
    %cst_1 = arith.constant 0.000000e+00 : f32
    %6 = vector.broadcast %cst_1 : f32 to vector<8x32xf32>
    %c0_2 = arith.constant 0 : index
    %c0_3 = arith.constant 0 : index
    %7 = vector.load %arg1[%c0_2, %c0_3] : memref<8x8xi32, #tpu.memory_space<vmem>>, vector<8x1xi32>
    %8 = vector.broadcast %7 : vector<8x1xi32> to vector<8x128xi32>
    %9 = vector.broadcast %1 : vector<1x128xi32> to vector<8x128xi32>
    %10 = arith.cmpi eq, %8, %9 : vector<8x128xi32>
    %11 = arith.extui %10 : vector<8x128xi1> to vector<8x128xi32>
    %12 = arith.sitofp %11 : vector<8x128xi32> to vector<8x128xf32>
    %c0_4 = arith.constant 0 : index
    %c0_5 = arith.constant 0 : index
    %13 = vector.load %arg3[%c0_4, %c0_5] : memref<128x128xf32, #tpu.memory_space<vmem>>, vector<128x128xf32>
    %cst_6 = arith.constant dense<0.000000e+00> : vector<8x128xf32>
    %14 = tpu.matmul %12, %13, %cst_6 {dimension_numbers = #tpu.dot_dimension_numbers<[1], [0], [0], [1], [0, 0, 1, 1], [], []>} : vector<8x128xf32>, vector<128x128xf32>, vector<8x128xf32> -> vector<8x128xf32>
    %c0_7 = arith.constant 0 : index
    %c7 = arith.constant 7 : index
    %15 = vector.load %arg1[%c0_7, %c7] : memref<8x8xi32, #tpu.memory_space<vmem>>, vector<8x1xi32>
    %16 = vector.broadcast %15 : vector<8x1xi32> to vector<8x128xi32>
    %17 = vector.broadcast %1 : vector<1x128xi32> to vector<8x128xi32>
    %18 = arith.cmpi eq, %16, %17 : vector<8x128xi32>
    %19 = arith.extui %18 : vector<8x128xi1> to vector<8x128xi32>
    %20 = arith.sitofp %19 : vector<8x128xi32> to vector<8x128xf32>
    %c0_8 = arith.constant 0 : index
    %c0_9 = arith.constant 0 : index
    %21 = vector.load %arg4[%c0_8, %c0_9] : memref<128x128xf32, #tpu.memory_space<vmem>>, vector<128x128xf32>
    %cst_10 = arith.constant dense<0.000000e+00> : vector<8x128xf32>
    %22 = tpu.matmul %20, %21, %cst_10 {dimension_numbers = #tpu.dot_dimension_numbers<[1], [0], [0], [1], [0, 0, 1, 1], [], []>} : vector<8x128xf32>, vector<128x128xf32>, vector<8x128xf32> -> vector<8x128xf32>
    %23 = arith.addf %14, %22 : vector<8x128xf32>
    %24 = arith.truncf %5 : vector<8x32xf32> to vector<8x32xbf16>
    %cst_11 = arith.constant dense<0.000000e+00> : vector<8x128xf32>
    %25 = tpu.matmul %24, %0, %cst_11 {dimension_numbers = #tpu.dot_dimension_numbers<[1], [0], [0], [1], [0, 0, 1, 1], [], []>} : vector<8x32xbf16>, vector<32x128xbf16>, vector<8x128xf32> -> vector<8x128xf32>
    %26 = arith.addf %23, %25 : vector<8x128xf32>
    %27 = vector.extract_strided_slice %26 {offsets = [0, 0], sizes = [8, 96], strides = [1, 1]} : vector<8x128xf32> to vector<8x96xf32>
    %28 = arith.negf %27 : vector<8x96xf32>
    %29 = math.exp %28 : vector<8x96xf32>
    %cst_12 = arith.constant 1.000000e+00 : f32
    %30 = vector.broadcast %cst_12 : f32 to vector<8x96xf32>
    %31 = arith.addf %30, %29 : vector<8x96xf32>
    %32 = arith.divf %30, %31 : vector<8x96xf32>
    %33 = vector.extract_strided_slice %32 {offsets = [0, 0], sizes = [8, 32], strides = [1, 1]} : vector<8x96xf32> to vector<8x32xf32>
    %34 = vector.extract_strided_slice %32 {offsets = [0, 32], sizes = [8, 32], strides = [1, 1]} : vector<8x96xf32> to vector<8x32xf32>
    %35 = vector.extract_strided_slice %32 {offsets = [0, 64], sizes = [8, 32], strides = [1, 1]} : vector<8x96xf32> to vector<8x32xf32>
    %36 = vector.extract_strided_slice %26 {offsets = [0, 96], sizes = [8, 32], strides = [1, 1]} : vector<8x128xf32> to vector<8x32xf32>
    %37 = math.tanh %36 : vector<8x32xf32>
    %38 = arith.mulf %34, %6 : vector<8x32xf32>
    %39 = arith.mulf %33, %37 : vector<8x32xf32>
    %40 = arith.addf %38, %39 : vector<8x32xf32>
    %41 = math.tanh %40 : vector<8x32xf32>
    %42 = arith.mulf %35, %41 : vector<8x32xf32>
    %c0_i32 = arith.constant 0 : i32
    %c7_i32 = arith.constant 7 : i32
    %43 = vector.broadcast %c0_i32 : i32 to vector<1x32xi32>
    %44 = vector.broadcast %c7_i32 : i32 to vector<1x32xi32>
    %45 = arith.select %4, %43, %44 : vector<1x32xi1>, vector<1x32xi32>
    %c0_13 = arith.constant 0 : index
    %c0_14 = arith.constant 0 : index
    %46 = vector.load %arg2[%c0_13, %c0_14] : memref<8x1xi32, #tpu.memory_space<vmem>>, vector<8x1xi32>
    %47 = vector.broadcast %45 : vector<1x32xi32> to vector<8x32xi32>
    %48 = vector.broadcast %46 : vector<8x1xi32> to vector<8x32xi32>
    %49 = arith.cmpi slt, %47, %48 : vector<8x32xi32>
    %50 = arith.select %49, %42, %5 : vector<8x32xi1>, vector<8x32xf32>
    %51 = arith.select %49, %40, %6 : vector<8x32xi1>, vector<8x32xf32>
    %c0_15 = arith.constant 0 : index
    %c1 = arith.constant 1 : index
    %52 = vector.load %arg1[%c0_15, %c1] : memref<8x8xi32, #tpu.memory_space<vmem>>, vector<8x1xi32>
    %53 = vector.broadcast %52 : vector<8x1xi32> to vector<8x128xi32>
    %54 = vector.broadcast %1 : vector<1x128xi32> to vector<8x128xi32>
    %55 = arith.cmpi eq, %53, %54 : vector<8x128xi32>
    %56 = arith.extui %55 : vector<8x128xi1> to vector<8x128xi32>
    %57 = arith.sitofp %56 : vector<8x128xi32> to vector<8x128xf32>
    %c0_16 = arith.constant 0 : index
    %c0_17 = arith.constant 0 : index
    %58 = vector.load %arg3[%c0_16, %c0_17] : memref<128x128xf32, #tpu.memory_space<vmem>>, vector<128x128xf32>
    %cst_18 = arith.constant dense<0.000000e+00> : vector<8x128xf32>
    %59 = tpu.matmul %57, %58, %cst_18 {dimension_numbers = #tpu.dot_dimension_numbers<[1], [0], [0], [1], [0, 0, 1, 1], [], []>} : vector<8x128xf32>, vector<128x128xf32>, vector<8x128xf32> -> vector<8x128xf32>
    %c0_19 = arith.constant 0 : index
    %c6 = arith.constant 6 : index
    %60 = vector.load %arg1[%c0_19, %c6] : memref<8x8xi32, #tpu.memory_space<vmem>>, vector<8x1xi32>
    %61 = vector.broadcast %60 : vector<8x1xi32> to vector<8x128xi32>
    %62 = vector.broadcast %1 : vector<1x128xi32> to vector<8x128xi32>
    %63 = arith.cmpi eq, %61, %62 : vector<8x128xi32>
    %64 = arith.extui %63 : vector<8x128xi1> to vector<8x128xi32>
    %65 = arith.sitofp %64 : vector<8x128xi32> to vector<8x128xf32>
    %c0_20 = arith.constant 0 : index
    %c0_21 = arith.constant 0 : index
    %66 = vector.load %arg4[%c0_20, %c0_21] : memref<128x128xf32, #tpu.memory_space<vmem>>, vector<128x128xf32>
    %cst_22 = arith.constant dense<0.000000e+00> : vector<8x128xf32>
    %67 = tpu.matmul %65, %66, %cst_22 {dimension_numbers = #tpu.dot_dimension_numbers<[1], [0], [0], [1], [0, 0, 1, 1], [], []>} : vector<8x128xf32>, vector<128x128xf32>, vector<8x128xf32> -> vector<8x128xf32>
    %68 = arith.addf %59, %67 : vector<8x128xf32>
    %69 = arith.truncf %50 : vector<8x32xf32> to vector<8x32xbf16>
    %cst_23 = arith.constant dense<0.000000e+00> : vector<8x128xf32>
    %70 = tpu.matmul %69, %0, %cst_23 {dimension_numbers = #tpu.dot_dimension_numbers<[1], [0], [0], [1], [0, 0, 1, 1], [], []>} : vector<8x32xbf16>, vector<32x128xbf16>, vector<8x128xf32> -> vector<8x128xf32>
    %71 = arith.addf %68, %70 : vector<8x128xf32>
    %72 = vector.extract_strided_slice %71 {offsets = [0, 0], sizes = [8, 96], strides = [1, 1]} : vector<8x128xf32> to vector<8x96xf32>
    %73 = arith.negf %72 : vector<8x96xf32>
    %74 = math.exp %73 : vector<8x96xf32>
    %cst_24 = arith.constant 1.000000e+00 : f32
    %75 = vector.broadcast %cst_24 : f32 to vector<8x96xf32>
    %76 = arith.addf %75, %74 : vector<8x96xf32>
    %77 = arith.divf %75, %76 : vector<8x96xf32>
    %78 = vector.extract_strided_slice %77 {offsets = [0, 0], sizes = [8, 32], strides = [1, 1]} : vector<8x96xf32> to vector<8x32xf32>
    %79 = vector.extract_strided_slice %77 {offsets = [0, 32], sizes = [8, 32], strides = [1, 1]} : vector<8x96xf32> to vector<8x32xf32>
    %80 = vector.extract_strided_slice %77 {offsets = [0, 64], sizes = [8, 32], strides = [1, 1]} : vector<8x96xf32> to vector<8x32xf32>
    %81 = vector.extract_strided_slice %71 {offsets = [0, 96], sizes = [8, 32], strides = [1, 1]} : vector<8x128xf32> to vector<8x32xf32>
    %82 = math.tanh %81 : vector<8x32xf32>
    %83 = arith.mulf %79, %51 : vector<8x32xf32>
    %84 = arith.mulf %78, %82 : vector<8x32xf32>
    %85 = arith.addf %83, %84 : vector<8x32xf32>
    %86 = math.tanh %85 : vector<8x32xf32>
    %87 = arith.mulf %80, %86 : vector<8x32xf32>
    %c1_i32 = arith.constant 1 : i32
    %c6_i32 = arith.constant 6 : i32
    %88 = vector.broadcast %c1_i32 : i32 to vector<1x32xi32>
    %89 = vector.broadcast %c6_i32 : i32 to vector<1x32xi32>
    %90 = arith.select %4, %88, %89 : vector<1x32xi1>, vector<1x32xi32>
    %c0_25 = arith.constant 0 : index
    %c0_26 = arith.constant 0 : index
    %91 = vector.load %arg2[%c0_25, %c0_26] : memref<8x1xi32, #tpu.memory_space<vmem>>, vector<8x1xi32>
    %92 = vector.broadcast %90 : vector<1x32xi32> to vector<8x32xi32>
    %93 = vector.broadcast %91 : vector<8x1xi32> to vector<8x32xi32>
    %94 = arith.cmpi slt, %92, %93 : vector<8x32xi32>
    %95 = arith.select %94, %87, %50 : vector<8x32xi1>, vector<8x32xf32>
    %96 = arith.select %94, %85, %51 : vector<8x32xi1>, vector<8x32xf32>
    %c0_27 = arith.constant 0 : index
    %c2 = arith.constant 2 : index
    %97 = vector.load %arg1[%c0_27, %c2] : memref<8x8xi32, #tpu.memory_space<vmem>>, vector<8x1xi32>
    %98 = vector.broadcast %97 : vector<8x1xi32> to vector<8x128xi32>
    %99 = vector.broadcast %1 : vector<1x128xi32> to vector<8x128xi32>
    %100 = arith.cmpi eq, %98, %99 : vector<8x128xi32>
    %101 = arith.extui %100 : vector<8x128xi1> to vector<8x128xi32>
    %102 = arith.sitofp %101 : vector<8x128xi32> to vector<8x128xf32>
    %c0_28 = arith.constant 0 : index
    %c0_29 = arith.constant 0 : index
    %103 = vector.load %arg3[%c0_28, %c0_29] : memref<128x128xf32, #tpu.memory_space<vmem>>, vector<128x128xf32>
    %cst_30 = arith.constant dense<0.000000e+00> : vector<8x128xf32>
    %104 = tpu.matmul %102, %103, %cst_30 {dimension_numbers = #tpu.dot_dimension_numbers<[1], [0], [0], [1], [0, 0, 1, 1], [], []>} : vector<8x128xf32>, vector<128x128xf32>, vector<8x128xf32> -> vector<8x128xf32>
    %c0_31 = arith.constant 0 : index
    %c5 = arith.constant 5 : index
    %105 = vector.load %arg1[%c0_31, %c5] : memref<8x8xi32, #tpu.memory_space<vmem>>, vector<8x1xi32>
    %106 = vector.broadcast %105 : vector<8x1xi32> to vector<8x128xi32>
    %107 = vector.broadcast %1 : vector<1x128xi32> to vector<8x128xi32>
    %108 = arith.cmpi eq, %106, %107 : vector<8x128xi32>
    %109 = arith.extui %108 : vector<8x128xi1> to vector<8x128xi32>
    %110 = arith.sitofp %109 : vector<8x128xi32> to vector<8x128xf32>
    %c0_32 = arith.constant 0 : index
    %c0_33 = arith.constant 0 : index
    %111 = vector.load %arg4[%c0_32, %c0_33] : memref<128x128xf32, #tpu.memory_space<vmem>>, vector<128x128xf32>
    %cst_34 = arith.constant dense<0.000000e+00> : vector<8x128xf32>
    %112 = tpu.matmul %110, %111, %cst_34 {dimension_numbers = #tpu.dot_dimension_numbers<[1], [0], [0], [1], [0, 0, 1, 1], [], []>} : vector<8x128xf32>, vector<128x128xf32>, vector<8x128xf32> -> vector<8x128xf32>
    %113 = arith.addf %104, %112 : vector<8x128xf32>
    %114 = arith.truncf %95 : vector<8x32xf32> to vector<8x32xbf16>
    %cst_35 = arith.constant dense<0.000000e+00> : vector<8x128xf32>
    %115 = tpu.matmul %114, %0, %cst_35 {dimension_numbers = #tpu.dot_dimension_numbers<[1], [0], [0], [1], [0, 0, 1, 1], [], []>} : vector<8x32xbf16>, vector<32x128xbf16>, vector<8x128xf32> -> vector<8x128xf32>
    %116 = arith.addf %113, %115 : vector<8x128xf32>
    %117 = vector.extract_strided_slice %116 {offsets = [0, 0], sizes = [8, 96], strides = [1, 1]} : vector<8x128xf32> to vector<8x96xf32>
    %118 = arith.negf %117 : vector<8x96xf32>
    %119 = math.exp %118 : vector<8x96xf32>
    %cst_36 = arith.constant 1.000000e+00 : f32
    %120 = vector.broadcast %cst_36 : f32 to vector<8x96xf32>
    %121 = arith.addf %120, %119 : vector<8x96xf32>
    %122 = arith.divf %120, %121 : vector<8x96xf32>
    %123 = vector.extract_strided_slice %122 {offsets = [0, 0], sizes = [8, 32], strides = [1, 1]} : vector<8x96xf32> to vector<8x32xf32>
    %124 = vector.extract_strided_slice %122 {offsets = [0, 32], sizes = [8, 32], strides = [1, 1]} : vector<8x96xf32> to vector<8x32xf32>
    %125 = vector.extract_strided_slice %122 {offsets = [0, 64], sizes = [8, 32], strides = [1, 1]} : vector<8x96xf32> to vector<8x32xf32>
    %126 = vector.extract_strided_slice %116 {offsets = [0, 96], sizes = [8, 32], strides = [1, 1]} : vector<8x128xf32> to vector<8x32xf32>
    %127 = math.tanh %126 : vector<8x32xf32>
    %128 = arith.mulf %124, %96 : vector<8x32xf32>
    %129 = arith.mulf %123, %127 : vector<8x32xf32>
    %130 = arith.addf %128, %129 : vector<8x32xf32>
    %131 = math.tanh %130 : vector<8x32xf32>
    %132 = arith.mulf %125, %131 : vector<8x32xf32>
    %c2_i32 = arith.constant 2 : i32
    %c5_i32 = arith.constant 5 : i32
    %133 = vector.broadcast %c2_i32 : i32 to vector<1x32xi32>
    %134 = vector.broadcast %c5_i32 : i32 to vector<1x32xi32>
    %135 = arith.select %4, %133, %134 : vector<1x32xi1>, vector<1x32xi32>
    %c0_37 = arith.constant 0 : index
    %c0_38 = arith.constant 0 : index
    %136 = vector.load %arg2[%c0_37, %c0_38] : memref<8x1xi32, #tpu.memory_space<vmem>>, vector<8x1xi32>
    %137 = vector.broadcast %135 : vector<1x32xi32> to vector<8x32xi32>
    %138 = vector.broadcast %136 : vector<8x1xi32> to vector<8x32xi32>
    %139 = arith.cmpi slt, %137, %138 : vector<8x32xi32>
    %140 = arith.select %139, %132, %95 : vector<8x32xi1>, vector<8x32xf32>
    %141 = arith.select %139, %130, %96 : vector<8x32xi1>, vector<8x32xf32>
    %c0_39 = arith.constant 0 : index
    %c3 = arith.constant 3 : index
    %142 = vector.load %arg1[%c0_39, %c3] : memref<8x8xi32, #tpu.memory_space<vmem>>, vector<8x1xi32>
    %143 = vector.broadcast %142 : vector<8x1xi32> to vector<8x128xi32>
    %144 = vector.broadcast %1 : vector<1x128xi32> to vector<8x128xi32>
    %145 = arith.cmpi eq, %143, %144 : vector<8x128xi32>
    %146 = arith.extui %145 : vector<8x128xi1> to vector<8x128xi32>
    %147 = arith.sitofp %146 : vector<8x128xi32> to vector<8x128xf32>
    %c0_40 = arith.constant 0 : index
    %c0_41 = arith.constant 0 : index
    %148 = vector.load %arg3[%c0_40, %c0_41] : memref<128x128xf32, #tpu.memory_space<vmem>>, vector<128x128xf32>
    %cst_42 = arith.constant dense<0.000000e+00> : vector<8x128xf32>
    %149 = tpu.matmul %147, %148, %cst_42 {dimension_numbers = #tpu.dot_dimension_numbers<[1], [0], [0], [1], [0, 0, 1, 1], [], []>} : vector<8x128xf32>, vector<128x128xf32>, vector<8x128xf32> -> vector<8x128xf32>
    %c0_43 = arith.constant 0 : index
    %c4 = arith.constant 4 : index
    %150 = vector.load %arg1[%c0_43, %c4] : memref<8x8xi32, #tpu.memory_space<vmem>>, vector<8x1xi32>
    %151 = vector.broadcast %150 : vector<8x1xi32> to vector<8x128xi32>
    %152 = vector.broadcast %1 : vector<1x128xi32> to vector<8x128xi32>
    %153 = arith.cmpi eq, %151, %152 : vector<8x128xi32>
    %154 = arith.extui %153 : vector<8x128xi1> to vector<8x128xi32>
    %155 = arith.sitofp %154 : vector<8x128xi32> to vector<8x128xf32>
    %c0_44 = arith.constant 0 : index
    %c0_45 = arith.constant 0 : index
    %156 = vector.load %arg4[%c0_44, %c0_45] : memref<128x128xf32, #tpu.memory_space<vmem>>, vector<128x128xf32>
    %cst_46 = arith.constant dense<0.000000e+00> : vector<8x128xf32>
    %157 = tpu.matmul %155, %156, %cst_46 {dimension_numbers = #tpu.dot_dimension_numbers<[1], [0], [0], [1], [0, 0, 1, 1], [], []>} : vector<8x128xf32>, vector<128x128xf32>, vector<8x128xf32> -> vector<8x128xf32>
    %158 = arith.addf %149, %157 : vector<8x128xf32>
    %159 = arith.truncf %140 : vector<8x32xf32> to vector<8x32xbf16>
    %cst_47 = arith.constant dense<0.000000e+00> : vector<8x128xf32>
    %160 = tpu.matmul %159, %0, %cst_47 {dimension_numbers = #tpu.dot_dimension_numbers<[1], [0], [0], [1], [0, 0, 1, 1], [], []>} : vector<8x32xbf16>, vector<32x128xbf16>, vector<8x128xf32> -> vector<8x128xf32>
    %161 = arith.addf %158, %160 : vector<8x128xf32>
    %162 = vector.extract_strided_slice %161 {offsets = [0, 0], sizes = [8, 96], strides = [1, 1]} : vector<8x128xf32> to vector<8x96xf32>
    %163 = arith.negf %162 : vector<8x96xf32>
    %164 = math.exp %163 : vector<8x96xf32>
    %cst_48 = arith.constant 1.000000e+00 : f32
    %165 = vector.broadcast %cst_48 : f32 to vector<8x96xf32>
    %166 = arith.addf %165, %164 : vector<8x96xf32>
    %167 = arith.divf %165, %166 : vector<8x96xf32>
    %168 = vector.extract_strided_slice %167 {offsets = [0, 0], sizes = [8, 32], strides = [1, 1]} : vector<8x96xf32> to vector<8x32xf32>
    %169 = vector.extract_strided_slice %167 {offsets = [0, 32], sizes = [8, 32], strides = [1, 1]} : vector<8x96xf32> to vector<8x32xf32>
    %170 = vector.extract_strided_slice %167 {offsets = [0, 64], sizes = [8, 32], strides = [1, 1]} : vector<8x96xf32> to vector<8x32xf32>
    %171 = vector.extract_strided_slice %161 {offsets = [0, 96], sizes = [8, 32], strides = [1, 1]} : vector<8x128xf32> to vector<8x32xf32>
    %172 = math.tanh %171 : vector<8x32xf32>
    %173 = arith.mulf %169, %141 : vector<8x32xf32>
    %174 = arith.mulf %168, %172 : vector<8x32xf32>
    %175 = arith.addf %173, %174 : vector<8x32xf32>
    %176 = math.tanh %175 : vector<8x32xf32>
    %177 = arith.mulf %170, %176 : vector<8x32xf32>
    %c3_i32 = arith.constant 3 : i32
    %c4_i32 = arith.constant 4 : i32
    %178 = vector.broadcast %c3_i32 : i32 to vector<1x32xi32>
    %179 = vector.broadcast %c4_i32 : i32 to vector<1x32xi32>
    %180 = arith.select %4, %178, %179 : vector<1x32xi1>, vector<1x32xi32>
    %c0_49 = arith.constant 0 : index
    %c0_50 = arith.constant 0 : index
    %181 = vector.load %arg2[%c0_49, %c0_50] : memref<8x1xi32, #tpu.memory_space<vmem>>, vector<8x1xi32>
    %182 = vector.broadcast %180 : vector<1x32xi32> to vector<8x32xi32>
    %183 = vector.broadcast %181 : vector<8x1xi32> to vector<8x32xi32>
    %184 = arith.cmpi slt, %182, %183 : vector<8x32xi32>
    %185 = arith.select %184, %177, %140 : vector<8x32xi1>, vector<8x32xf32>
    %186 = arith.select %184, %175, %141 : vector<8x32xi1>, vector<8x32xf32>
    %c0_51 = arith.constant 0 : index
    %c4_52 = arith.constant 4 : index
    %187 = vector.load %arg1[%c0_51, %c4_52] : memref<8x8xi32, #tpu.memory_space<vmem>>, vector<8x1xi32>
    %188 = vector.broadcast %187 : vector<8x1xi32> to vector<8x128xi32>
    %189 = vector.broadcast %1 : vector<1x128xi32> to vector<8x128xi32>
    %190 = arith.cmpi eq, %188, %189 : vector<8x128xi32>
    %191 = arith.extui %190 : vector<8x128xi1> to vector<8x128xi32>
    %192 = arith.sitofp %191 : vector<8x128xi32> to vector<8x128xf32>
    %c0_53 = arith.constant 0 : index
    %c0_54 = arith.constant 0 : index
    %193 = vector.load %arg3[%c0_53, %c0_54] : memref<128x128xf32, #tpu.memory_space<vmem>>, vector<128x128xf32>
    %cst_55 = arith.constant dense<0.000000e+00> : vector<8x128xf32>
    %194 = tpu.matmul %192, %193, %cst_55 {dimension_numbers = #tpu.dot_dimension_numbers<[1], [0], [0], [1], [0, 0, 1, 1], [], []>} : vector<8x128xf32>, vector<128x128xf32>, vector<8x128xf32> -> vector<8x128xf32>
    %c0_56 = arith.constant 0 : index
    %c3_57 = arith.constant 3 : index
    %195 = vector.load %arg1[%c0_56, %c3_57] : memref<8x8xi32, #tpu.memory_space<vmem>>, vector<8x1xi32>
    %196 = vector.broadcast %195 : vector<8x1xi32> to vector<8x128xi32>
    %197 = vector.broadcast %1 : vector<1x128xi32> to vector<8x128xi32>
    %198 = arith.cmpi eq, %196, %197 : vector<8x128xi32>
    %199 = arith.extui %198 : vector<8x128xi1> to vector<8x128xi32>
    %200 = arith.sitofp %199 : vector<8x128xi32> to vector<8x128xf32>
    %c0_58 = arith.constant 0 : index
    %c0_59 = arith.constant 0 : index
    %201 = vector.load %arg4[%c0_58, %c0_59] : memref<128x128xf32, #tpu.memory_space<vmem>>, vector<128x128xf32>
    %cst_60 = arith.constant dense<0.000000e+00> : vector<8x128xf32>
    %202 = tpu.matmul %200, %201, %cst_60 {dimension_numbers = #tpu.dot_dimension_numbers<[1], [0], [0], [1], [0, 0, 1, 1], [], []>} : vector<8x128xf32>, vector<128x128xf32>, vector<8x128xf32> -> vector<8x128xf32>
    %203 = arith.addf %194, %202 : vector<8x128xf32>
    %204 = arith.truncf %185 : vector<8x32xf32> to vector<8x32xbf16>
    %cst_61 = arith.constant dense<0.000000e+00> : vector<8x128xf32>
    %205 = tpu.matmul %204, %0, %cst_61 {dimension_numbers = #tpu.dot_dimension_numbers<[1], [0], [0], [1], [0, 0, 1, 1], [], []>} : vector<8x32xbf16>, vector<32x128xbf16>, vector<8x128xf32> -> vector<8x128xf32>
    %206 = arith.addf %203, %205 : vector<8x128xf32>
    %207 = vector.extract_strided_slice %206 {offsets = [0, 0], sizes = [8, 96], strides = [1, 1]} : vector<8x128xf32> to vector<8x96xf32>
    %208 = arith.negf %207 : vector<8x96xf32>
    %209 = math.exp %208 : vector<8x96xf32>
    %cst_62 = arith.constant 1.000000e+00 : f32
    %210 = vector.broadcast %cst_62 : f32 to vector<8x96xf32>
    %211 = arith.addf %210, %209 : vector<8x96xf32>
    %212 = arith.divf %210, %211 : vector<8x96xf32>
    %213 = vector.extract_strided_slice %212 {offsets = [0, 0], sizes = [8, 32], strides = [1, 1]} : vector<8x96xf32> to vector<8x32xf32>
    %214 = vector.extract_strided_slice %212 {offsets = [0, 32], sizes = [8, 32], strides = [1, 1]} : vector<8x96xf32> to vector<8x32xf32>
    %215 = vector.extract_strided_slice %212 {offsets = [0, 64], sizes = [8, 32], strides = [1, 1]} : vector<8x96xf32> to vector<8x32xf32>
    %216 = vector.extract_strided_slice %206 {offsets = [0, 96], sizes = [8, 32], strides = [1, 1]} : vector<8x128xf32> to vector<8x32xf32>
    %217 = math.tanh %216 : vector<8x32xf32>
    %218 = arith.mulf %214, %186 : vector<8x32xf32>
    %219 = arith.mulf %213, %217 : vector<8x32xf32>
    %220 = arith.addf %218, %219 : vector<8x32xf32>
    %221 = math.tanh %220 : vector<8x32xf32>
    %222 = arith.mulf %215, %221 : vector<8x32xf32>
    %c4_i32_63 = arith.constant 4 : i32
    %c3_i32_64 = arith.constant 3 : i32
    %223 = vector.broadcast %c4_i32_63 : i32 to vector<1x32xi32>
    %224 = vector.broadcast %c3_i32_64 : i32 to vector<1x32xi32>
    %225 = arith.select %4, %223, %224 : vector<1x32xi1>, vector<1x32xi32>
    %c0_65 = arith.constant 0 : index
    %c0_66 = arith.constant 0 : index
    %226 = vector.load %arg2[%c0_65, %c0_66] : memref<8x1xi32, #tpu.memory_space<vmem>>, vector<8x1xi32>
    %227 = vector.broadcast %225 : vector<1x32xi32> to vector<8x32xi32>
    %228 = vector.broadcast %226 : vector<8x1xi32> to vector<8x32xi32>
    %229 = arith.cmpi slt, %227, %228 : vector<8x32xi32>
    %230 = arith.select %229, %222, %185 : vector<8x32xi1>, vector<8x32xf32>
    %231 = arith.select %229, %220, %186 : vector<8x32xi1>, vector<8x32xf32>
    %c0_67 = arith.constant 0 : index
    %c5_68 = arith.constant 5 : index
    %232 = vector.load %arg1[%c0_67, %c5_68] : memref<8x8xi32, #tpu.memory_space<vmem>>, vector<8x1xi32>
    %233 = vector.broadcast %232 : vector<8x1xi32> to vector<8x128xi32>
    %234 = vector.broadcast %1 : vector<1x128xi32> to vector<8x128xi32>
    %235 = arith.cmpi eq, %233, %234 : vector<8x128xi32>
    %236 = arith.extui %235 : vector<8x128xi1> to vector<8x128xi32>
    %237 = arith.sitofp %236 : vector<8x128xi32> to vector<8x128xf32>
    %c0_69 = arith.constant 0 : index
    %c0_70 = arith.constant 0 : index
    %238 = vector.load %arg3[%c0_69, %c0_70] : memref<128x128xf32, #tpu.memory_space<vmem>>, vector<128x128xf32>
    %cst_71 = arith.constant dense<0.000000e+00> : vector<8x128xf32>
    %239 = tpu.matmul %237, %238, %cst_71 {dimension_numbers = #tpu.dot_dimension_numbers<[1], [0], [0], [1], [0, 0, 1, 1], [], []>} : vector<8x128xf32>, vector<128x128xf32>, vector<8x128xf32> -> vector<8x128xf32>
    %c0_72 = arith.constant 0 : index
    %c2_73 = arith.constant 2 : index
    %240 = vector.load %arg1[%c0_72, %c2_73] : memref<8x8xi32, #tpu.memory_space<vmem>>, vector<8x1xi32>
    %241 = vector.broadcast %240 : vector<8x1xi32> to vector<8x128xi32>
    %242 = vector.broadcast %1 : vector<1x128xi32> to vector<8x128xi32>
    %243 = arith.cmpi eq, %241, %242 : vector<8x128xi32>
    %244 = arith.extui %243 : vector<8x128xi1> to vector<8x128xi32>
    %245 = arith.sitofp %244 : vector<8x128xi32> to vector<8x128xf32>
    %c0_74 = arith.constant 0 : index
    %c0_75 = arith.constant 0 : index
    %246 = vector.load %arg4[%c0_74, %c0_75] : memref<128x128xf32, #tpu.memory_space<vmem>>, vector<128x128xf32>
    %cst_76 = arith.constant dense<0.000000e+00> : vector<8x128xf32>
    %247 = tpu.matmul %245, %246, %cst_76 {dimension_numbers = #tpu.dot_dimension_numbers<[1], [0], [0], [1], [0, 0, 1, 1], [], []>} : vector<8x128xf32>, vector<128x128xf32>, vector<8x128xf32> -> vector<8x128xf32>
    %248 = arith.addf %239, %247 : vector<8x128xf32>
    %249 = arith.truncf %230 : vector<8x32xf32> to vector<8x32xbf16>
    %cst_77 = arith.constant dense<0.000000e+00> : vector<8x128xf32>
    %250 = tpu.matmul %249, %0, %cst_77 {dimension_numbers = #tpu.dot_dimension_numbers<[1], [0], [0], [1], [0, 0, 1, 1], [], []>} : vector<8x32xbf16>, vector<32x128xbf16>, vector<8x128xf32> -> vector<8x128xf32>
    %251 = arith.addf %248, %250 : vector<8x128xf32>
    %252 = vector.extract_strided_slice %251 {offsets = [0, 0], sizes = [8, 96], strides = [1, 1]} : vector<8x128xf32> to vector<8x96xf32>
    %253 = arith.negf %252 : vector<8x96xf32>
    %254 = math.exp %253 : vector<8x96xf32>
    %cst_78 = arith.constant 1.000000e+00 : f32
    %255 = vector.broadcast %cst_78 : f32 to vector<8x96xf32>
    %256 = arith.addf %255, %254 : vector<8x96xf32>
    %257 = arith.divf %255, %256 : vector<8x96xf32>
    %258 = vector.extract_strided_slice %257 {offsets = [0, 0], sizes = [8, 32], strides = [1, 1]} : vector<8x96xf32> to vector<8x32xf32>
    %259 = vector.extract_strided_slice %257 {offsets = [0, 32], sizes = [8, 32], strides = [1, 1]} : vector<8x96xf32> to vector<8x32xf32>
    %260 = vector.extract_strided_slice %257 {offsets = [0, 64], sizes = [8, 32], strides = [1, 1]} : vector<8x96xf32> to vector<8x32xf32>
    %261 = vector.extract_strided_slice %251 {offsets = [0, 96], sizes = [8, 32], strides = [1, 1]} : vector<8x128xf32> to vector<8x32xf32>
    %262 = math.tanh %261 : vector<8x32xf32>
    %263 = arith.mulf %259, %231 : vector<8x32xf32>
    %264 = arith.mulf %258, %262 : vector<8x32xf32>
    %265 = arith.addf %263, %264 : vector<8x32xf32>
    %266 = math.tanh %265 : vector<8x32xf32>
    %267 = arith.mulf %260, %266 : vector<8x32xf32>
    %c5_i32_79 = arith.constant 5 : i32
    %c2_i32_80 = arith.constant 2 : i32
    %268 = vector.broadcast %c5_i32_79 : i32 to vector<1x32xi32>
    %269 = vector.broadcast %c2_i32_80 : i32 to vector<1x32xi32>
    %270 = arith.select %4, %268, %269 : vector<1x32xi1>, vector<1x32xi32>
    %c0_81 = arith.constant 0 : index
    %c0_82 = arith.constant 0 : index
    %271 = vector.load %arg2[%c0_81, %c0_82] : memref<8x1xi32, #tpu.memory_space<vmem>>, vector<8x1xi32>
    %272 = vector.broadcast %270 : vector<1x32xi32> to vector<8x32xi32>
    %273 = vector.broadcast %271 : vector<8x1xi32> to vector<8x32xi32>
    %274 = arith.cmpi slt, %272, %273 : vector<8x32xi32>
    %275 = arith.select %274, %267, %230 : vector<8x32xi1>, vector<8x32xf32>
    %276 = arith.select %274, %265, %231 : vector<8x32xi1>, vector<8x32xf32>
    %c0_83 = arith.constant 0 : index
    %c6_84 = arith.constant 6 : index
    %277 = vector.load %arg1[%c0_83, %c6_84] : memref<8x8xi32, #tpu.memory_space<vmem>>, vector<8x1xi32>
    %278 = vector.broadcast %277 : vector<8x1xi32> to vector<8x128xi32>
    %279 = vector.broadcast %1 : vector<1x128xi32> to vector<8x128xi32>
    %280 = arith.cmpi eq, %278, %279 : vector<8x128xi32>
    %281 = arith.extui %280 : vector<8x128xi1> to vector<8x128xi32>
    %282 = arith.sitofp %281 : vector<8x128xi32> to vector<8x128xf32>
    %c0_85 = arith.constant 0 : index
    %c0_86 = arith.constant 0 : index
    %283 = vector.load %arg3[%c0_85, %c0_86] : memref<128x128xf32, #tpu.memory_space<vmem>>, vector<128x128xf32>
    %cst_87 = arith.constant dense<0.000000e+00> : vector<8x128xf32>
    %284 = tpu.matmul %282, %283, %cst_87 {dimension_numbers = #tpu.dot_dimension_numbers<[1], [0], [0], [1], [0, 0, 1, 1], [], []>} : vector<8x128xf32>, vector<128x128xf32>, vector<8x128xf32> -> vector<8x128xf32>
    %c0_88 = arith.constant 0 : index
    %c1_89 = arith.constant 1 : index
    %285 = vector.load %arg1[%c0_88, %c1_89] : memref<8x8xi32, #tpu.memory_space<vmem>>, vector<8x1xi32>
    %286 = vector.broadcast %285 : vector<8x1xi32> to vector<8x128xi32>
    %287 = vector.broadcast %1 : vector<1x128xi32> to vector<8x128xi32>
    %288 = arith.cmpi eq, %286, %287 : vector<8x128xi32>
    %289 = arith.extui %288 : vector<8x128xi1> to vector<8x128xi32>
    %290 = arith.sitofp %289 : vector<8x128xi32> to vector<8x128xf32>
    %c0_90 = arith.constant 0 : index
    %c0_91 = arith.constant 0 : index
    %291 = vector.load %arg4[%c0_90, %c0_91] : memref<128x128xf32, #tpu.memory_space<vmem>>, vector<128x128xf32>
    %cst_92 = arith.constant dense<0.000000e+00> : vector<8x128xf32>
    %292 = tpu.matmul %290, %291, %cst_92 {dimension_numbers = #tpu.dot_dimension_numbers<[1], [0], [0], [1], [0, 0, 1, 1], [], []>} : vector<8x128xf32>, vector<128x128xf32>, vector<8x128xf32> -> vector<8x128xf32>
    %293 = arith.addf %284, %292 : vector<8x128xf32>
    %294 = arith.truncf %275 : vector<8x32xf32> to vector<8x32xbf16>
    %cst_93 = arith.constant dense<0.000000e+00> : vector<8x128xf32>
    %295 = tpu.matmul %294, %0, %cst_93 {dimension_numbers = #tpu.dot_dimension_numbers<[1], [0], [0], [1], [0, 0, 1, 1], [], []>} : vector<8x32xbf16>, vector<32x128xbf16>, vector<8x128xf32> -> vector<8x128xf32>
    %296 = arith.addf %293, %295 : vector<8x128xf32>
    %297 = vector.extract_strided_slice %296 {offsets = [0, 0], sizes = [8, 96], strides = [1, 1]} : vector<8x128xf32> to vector<8x96xf32>
    %298 = arith.negf %297 : vector<8x96xf32>
    %299 = math.exp %298 : vector<8x96xf32>
    %cst_94 = arith.constant 1.000000e+00 : f32
    %300 = vector.broadcast %cst_94 : f32 to vector<8x96xf32>
    %301 = arith.addf %300, %299 : vector<8x96xf32>
    %302 = arith.divf %300, %301 : vector<8x96xf32>
    %303 = vector.extract_strided_slice %302 {offsets = [0, 0], sizes = [8, 32], strides = [1, 1]} : vector<8x96xf32> to vector<8x32xf32>
    %304 = vector.extract_strided_slice %302 {offsets = [0, 32], sizes = [8, 32], strides = [1, 1]} : vector<8x96xf32> to vector<8x32xf32>
    %305 = vector.extract_strided_slice %302 {offsets = [0, 64], sizes = [8, 32], strides = [1, 1]} : vector<8x96xf32> to vector<8x32xf32>
    %306 = vector.extract_strided_slice %296 {offsets = [0, 96], sizes = [8, 32], strides = [1, 1]} : vector<8x128xf32> to vector<8x32xf32>
    %307 = math.tanh %306 : vector<8x32xf32>
    %308 = arith.mulf %304, %276 : vector<8x32xf32>
    %309 = arith.mulf %303, %307 : vector<8x32xf32>
    %310 = arith.addf %308, %309 : vector<8x32xf32>
    %311 = math.tanh %310 : vector<8x32xf32>
    %312 = arith.mulf %305, %311 : vector<8x32xf32>
    %c6_i32_95 = arith.constant 6 : i32
    %c1_i32_96 = arith.constant 1 : i32
    %313 = vector.broadcast %c6_i32_95 : i32 to vector<1x32xi32>
    %314 = vector.broadcast %c1_i32_96 : i32 to vector<1x32xi32>
    %315 = arith.select %4, %313, %314 : vector<1x32xi1>, vector<1x32xi32>
    %c0_97 = arith.constant 0 : index
    %c0_98 = arith.constant 0 : index
    %316 = vector.load %arg2[%c0_97, %c0_98] : memref<8x1xi32, #tpu.memory_space<vmem>>, vector<8x1xi32>
    %317 = vector.broadcast %315 : vector<1x32xi32> to vector<8x32xi32>
    %318 = vector.broadcast %316 : vector<8x1xi32> to vector<8x32xi32>
    %319 = arith.cmpi slt, %317, %318 : vector<8x32xi32>
    %320 = arith.select %319, %312, %275 : vector<8x32xi1>, vector<8x32xf32>
    %321 = arith.select %319, %310, %276 : vector<8x32xi1>, vector<8x32xf32>
    %c0_99 = arith.constant 0 : index
    %c7_100 = arith.constant 7 : index
    %322 = vector.load %arg1[%c0_99, %c7_100] : memref<8x8xi32, #tpu.memory_space<vmem>>, vector<8x1xi32>
    %323 = vector.broadcast %322 : vector<8x1xi32> to vector<8x128xi32>
    %324 = vector.broadcast %1 : vector<1x128xi32> to vector<8x128xi32>
    %325 = arith.cmpi eq, %323, %324 : vector<8x128xi32>
    %326 = arith.extui %325 : vector<8x128xi1> to vector<8x128xi32>
    %327 = arith.sitofp %326 : vector<8x128xi32> to vector<8x128xf32>
    %c0_101 = arith.constant 0 : index
    %c0_102 = arith.constant 0 : index
    %328 = vector.load %arg3[%c0_101, %c0_102] : memref<128x128xf32, #tpu.memory_space<vmem>>, vector<128x128xf32>
    %cst_103 = arith.constant dense<0.000000e+00> : vector<8x128xf32>
    %329 = tpu.matmul %327, %328, %cst_103 {dimension_numbers = #tpu.dot_dimension_numbers<[1], [0], [0], [1], [0, 0, 1, 1], [], []>} : vector<8x128xf32>, vector<128x128xf32>, vector<8x128xf32> -> vector<8x128xf32>
    %c0_104 = arith.constant 0 : index
    %c0_105 = arith.constant 0 : index
    %330 = vector.load %arg1[%c0_104, %c0_105] : memref<8x8xi32, #tpu.memory_space<vmem>>, vector<8x1xi32>
    %331 = vector.broadcast %330 : vector<8x1xi32> to vector<8x128xi32>
    %332 = vector.broadcast %1 : vector<1x128xi32> to vector<8x128xi32>
    %333 = arith.cmpi eq, %331, %332 : vector<8x128xi32>
    %334 = arith.extui %333 : vector<8x128xi1> to vector<8x128xi32>
    %335 = arith.sitofp %334 : vector<8x128xi32> to vector<8x128xf32>
    %c0_106 = arith.constant 0 : index
    %c0_107 = arith.constant 0 : index
    %336 = vector.load %arg4[%c0_106, %c0_107] : memref<128x128xf32, #tpu.memory_space<vmem>>, vector<128x128xf32>
    %cst_108 = arith.constant dense<0.000000e+00> : vector<8x128xf32>
    %337 = tpu.matmul %335, %336, %cst_108 {dimension_numbers = #tpu.dot_dimension_numbers<[1], [0], [0], [1], [0, 0, 1, 1], [], []>} : vector<8x128xf32>, vector<128x128xf32>, vector<8x128xf32> -> vector<8x128xf32>
    %338 = arith.addf %329, %337 : vector<8x128xf32>
    %339 = arith.truncf %320 : vector<8x32xf32> to vector<8x32xbf16>
    %cst_109 = arith.constant dense<0.000000e+00> : vector<8x128xf32>
    %340 = tpu.matmul %339, %0, %cst_109 {dimension_numbers = #tpu.dot_dimension_numbers<[1], [0], [0], [1], [0, 0, 1, 1], [], []>} : vector<8x32xbf16>, vector<32x128xbf16>, vector<8x128xf32> -> vector<8x128xf32>
    %341 = arith.addf %338, %340 : vector<8x128xf32>
    %342 = vector.extract_strided_slice %341 {offsets = [0, 0], sizes = [8, 96], strides = [1, 1]} : vector<8x128xf32> to vector<8x96xf32>
    %343 = arith.negf %342 : vector<8x96xf32>
    %344 = math.exp %343 : vector<8x96xf32>
    %cst_110 = arith.constant 1.000000e+00 : f32
    %345 = vector.broadcast %cst_110 : f32 to vector<8x96xf32>
    %346 = arith.addf %345, %344 : vector<8x96xf32>
    %347 = arith.divf %345, %346 : vector<8x96xf32>
    %348 = vector.extract_strided_slice %347 {offsets = [0, 0], sizes = [8, 32], strides = [1, 1]} : vector<8x96xf32> to vector<8x32xf32>
    %349 = vector.extract_strided_slice %347 {offsets = [0, 32], sizes = [8, 32], strides = [1, 1]} : vector<8x96xf32> to vector<8x32xf32>
    %350 = vector.extract_strided_slice %347 {offsets = [0, 64], sizes = [8, 32], strides = [1, 1]} : vector<8x96xf32> to vector<8x32xf32>
    %351 = vector.extract_strided_slice %341 {offsets = [0, 96], sizes = [8, 32], strides = [1, 1]} : vector<8x128xf32> to vector<8x32xf32>
    %352 = math.tanh %351 : vector<8x32xf32>
    %353 = arith.mulf %349, %321 : vector<8x32xf32>
    %354 = arith.mulf %348, %352 : vector<8x32xf32>
    %355 = arith.addf %353, %354 : vector<8x32xf32>
    %356 = math.tanh %355 : vector<8x32xf32>
    %357 = arith.mulf %350, %356 : vector<8x32xf32>
    %c7_i32_111 = arith.constant 7 : i32
    %c0_i32_112 = arith.constant 0 : i32
    %358 = vector.broadcast %c7_i32_111 : i32 to vector<1x32xi32>
    %359 = vector.broadcast %c0_i32_112 : i32 to vector<1x32xi32>
    %360 = arith.select %4, %358, %359 : vector<1x32xi1>, vector<1x32xi32>
    %c0_113 = arith.constant 0 : index
    %c0_114 = arith.constant 0 : index
    %361 = vector.load %arg2[%c0_113, %c0_114] : memref<8x1xi32, #tpu.memory_space<vmem>>, vector<8x1xi32>
    %362 = vector.broadcast %360 : vector<1x32xi32> to vector<8x32xi32>
    %363 = vector.broadcast %361 : vector<8x1xi32> to vector<8x32xi32>
    %364 = arith.cmpi slt, %362, %363 : vector<8x32xi32>
    %365 = arith.select %364, %357, %320 : vector<8x32xi1>, vector<8x32xf32>
    %c0_115 = arith.constant 0 : index
    %c0_116 = arith.constant 0 : index
    %366 = vector.load %arg6[%c0_115, %c0_116] : memref<8x32xf32, #tpu.memory_space<vmem>>, vector<8x32xf32>
    tpu.vector_store %arg6[%c0_115, %c0_116], %365 {strides = array<i32>} : memref<8x32xf32, #tpu.memory_space<vmem>>, vector<8x32xf32>,
    return
  }
  func.func @transform_0(%arg0: i32) -> (i32, i32) {
    %c0_i32 = arith.constant 0 : i32
    %c0_i32_0 = arith.constant 0 : i32
    return %arg0, %c0_i32 : i32, i32
  }
  func.func @transform_1(%arg0: i32) -> (i32, i32) {
    %c0_i32 = arith.constant 0 : i32
    %c0_i32_0 = arith.constant 0 : i32
    return %arg0, %c0_i32 : i32, i32
  }
  func.func @transform_2(%arg0: i32) -> (i32, i32) {
    %c0_i32 = arith.constant 0 : i32
    %c0_i32_0 = arith.constant 0 : i32
    %c0_i32_1 = arith.constant 0 : i32
    return %c0_i32, %c0_i32_0 : i32, i32
  }
  func.func @transform_3(%arg0: i32) -> (i32, i32) {
    %c0_i32 = arith.constant 0 : i32
    %c0_i32_0 = arith.constant 0 : i32
    %c0_i32_1 = arith.constant 0 : i32
    return %c0_i32, %c0_i32_0 : i32, i32
  }
  func.func @transform_4(%arg0: i32) -> (i32, i32) {
    %c0_i32 = arith.constant 0 : i32
    %c0_i32_0 = arith.constant 0 : i32
    %c0_i32_1 = arith.constant 0 : i32
    return %c0_i32, %c0_i32_0 : i32, i32
  }
  func.func @transform_5(%arg0: i32) -> (i32, i32) {
    %c0_i32 = arith.constant 0 : i32
    %c0_i32_0 = arith.constant 0 : i32
    return %arg0, %c0_i32 : i32, i32
  }
}

</mosaic_0001>

<bundles_post_ra>
// kernel: tpu_custom_call.1
= control target key start
LH: loop header
LB: loop body
LE: loop exit
PB: predicated region body
PF: predicated region fallthrough
CT: control target
= control target key end

     0   :  { %10 = vsyncpa [#allocation3], 0  ;;  %s4261_s0 = inlined_call_operand.hbm [shape: s32[8,8], index: 0, kind: input, shape index: {}]   ;;  %s4262_s1 = inlined_call_operand.vmem [shape: s32[8,1], index: 1, kind: input, shape index: {}]   ;;  %s4263_s2 = inlined_call_operand.hbm [shape: f32[128,128], index: 2, kind: input, shape index: {}]   ;;  %s4264_s3 = inlined_call_operand.hbm [shape: f32[128,128], index: 3, kind: input, shape index: {}]   ;;  %s4265_s4 = inlined_call_operand.vmem [shape: bf16[32,128], index: 4, kind: input, shape index: {}]   ;;  %s4266_s5 = inlined_call_operand.hbm [shape: f32[8,32], index: 5, kind: output, shape index: {}]  }
   0x1   :  { %11 = vsyncpa [#allocation6], 0 }
   0x2   :  { %12 = vsyncpa [#allocation4], 0  ;;  %s3150_s18 = smov [#allocation5]  }
   0x3   :  { %s30_s19 = sshll.u32 %s3150_s18, 4  ;;  %s31_s19 = int_to_ptr.vmem [resolvable:$true] %s30_s19 }
   0x4   :  { %s3072_s20 = scalar_lea.vmem %s31_s19, 2048  ;;  %p3077_p1 = scmp.lt.s32.totalorder %s31_s19, %s31_s19 }
   0x5   :  { %p3073_p0 = scmp.ne.s32.totalorder %s31_s19, %s3072_s20  ;;  %p3078_p2 = scmp.lt.s32.totalorder %s3072_s20, %s3072_s20 }
   0x7   :  { %p3079_p3 = por %p3078_p2, %p3077_p1 }
   0x9   :  { %p3080_p4 = pnand %p3079_p3, %p3073_p0 }
   0xb   :  { %3083 = shalt.err (!%p3080_p4)
}
   0xc   :  { %s3151_s21 = smov 128   ;;  %s3152_s22 = smov 8  }
   0xd   :  { %36 = dma.hbm_to_vmem [thread:$0]  %s4263_s2, 2048, %s31_s19, [#allocation6], %s3151_s21, %s3151_s21, %s3152_s22  }
   0xe   :  { %s3153_s25 = smov [#allocation2]   ;;  %s3154_s27 = smov [#allocation7]  }
   0xf   :  { %s19_s26 = sshll.u32 %s3153_s25, 4  ;;  %s42_s28 = sshll.u32 %s3154_s27, 4  ;;  %s20_s26 = int_to_ptr.vmem [resolvable:$true] %s19_s26  ;;  %s43_s28 = int_to_ptr.vmem [resolvable:$true] %s42_s28 }
  0x10   :  { %s3092_s29 = scalar_lea.vmem %s20_s26, 128  ;;  %p3097_p6 = scmp.lt.s32.totalorder %s20_s26, %s20_s26 }
  0x11   :  { %p3093_p5 = scmp.ne.s32.totalorder %s20_s26, %s3092_s29  ;;  %p3098_p7 = scmp.lt.s32.totalorder %s3092_s29, %s3092_s29 }
  0x13   :  { %p3099_p8 = por %p3098_p7, %p3097_p6 }
  0x15   :  { %p3100_p9 = pnand %p3099_p8, %p3093_p5 }
  0x17   :  { %3103 = shalt.err (!%p3100_p9)
}
  0x18   :  { %22 = dma.hbm_to_vmem [thread:$0]  %s4261_s0, 128, %s20_s26, [#allocation3]  }
  0x19   :  { %s3112_s7 = scalar_lea.vmem %s43_s28, 2048  ;;  %p3117_p11 = scmp.lt.s32.totalorder %s43_s28, %s43_s28 }
  0x1a   :  { %p3113_p10 = scmp.ne.s32.totalorder %s43_s28, %s3112_s7  ;;  %p3118_p12 = scmp.lt.s32.totalorder %s3112_s7, %s3112_s7 }
  0x1c   :  { %p3119_p13 = por %p3118_p12, %p3117_p11 }
  0x1e   :  { %p3120_p0 = pnand %p3119_p13, %p3113_p10 }
  0x20   :  { %3123 = shalt.err (!%p3120_p0)
}
  0x21   :  { %48 = dma.hbm_to_vmem [thread:$0]  %s4264_s3, 2048, %s43_s28, [#allocation6], %s3151_s21, %s3151_s21, %s3152_s22  }
  0x22   :  { %3144 = dma.done.wait [#allocation3], 128  }
  0x23   :  { %3145 = vsyncadd [#allocation3], 4294967168 }
  0x24   :  { %3146 = dma.done.wait [#allocation6], 4096  }
  0x25   :  { %3147 = vsyncadd [#allocation6], 4294963200  ;;  %v3155_v0 = vmov 7   ;;  %v3156_v1 = vmov 0.0   ;;  %v4267_v2 = vmov 0   ;;  %vm3158_vm0 = vmmov 0  }
  0x26   :  { %2954 = vset.pattern.permute.xlu0 %v3155_v0  ;;  %2310 = vmatprep.subr.mxu0 %v3156_v1  ;;  %v3217_v3 = vld [vmem:[#allocation2] sm:$0xff]  ;;  %v3221_v5 = vld [vmem:[#allocation7 + $0x70] sm:$0xff]  ;;  %v3228_v7 = vld [vmem:[#allocation7 + $0x68] sm:$0xff]  ;;  %v65_v36 = vlaneseq  ;;  %v3159_v40 = vmov 1.0   ;;  %s3160_s11 = smov 32   ;;  %v3161_v60 = vmov 6  }
  0x27   :  { %2345 = vmatprep.subr.mxu1 %v3156_v1  ;;  %2957 = vset.pattern.permute.xlu1 %v4267_v2  ;;  %v3219_v4 = vld [vmem:[#allocation7 + $0x78] sm:$0xff]  ;;  %v3231_v8 = vld [vmem:[#allocation5 + $0x70] sm:$0xff]  ;;  %v3236_v9 = vld [vmem:[#allocation7 + $0x60] sm:$0xff]  ;;  %s3163_s14 = smov 96   ;;  %vm265_vm10 = vcmask 261120  }
  0x28   :  { %2342 = vmatprep.mubr.msk.f32.mxu0 %vm3158_vm0, %v3156_v1  ;;  %2377 = vmatprep.mubr.msk.f32.mxu1 %vm3158_vm0, %v3156_v1  ;;  %v3225_v6 = vld [vmem:[#allocation5 + $0x78] sm:$0xff]  ;;  %v3241_v10 = vld [vmem:[#allocation5 + $0x68] sm:$0xff]  ;;  %v3249_v12 = vld [vmem:[#allocation5 + $0x60] sm:$0xff]  ;;  %v3350_v37 = vand.u32 127, %v65_v36 }
  0x29   :  { %92 = vperm.xlu0 %2954, %v3217_v3   ;;  %2311 = vmatpush3.msra.mxu0 %v3219_v4  ;;  %v3245_v11 = vld [vmem:[#allocation7 + $0x58] sm:$0xff]  ;;  %v3252_v13 = vld [vmem:[#allocation7 + $0x50] sm:$0xff]  ;;  %v3260_v15 = vld [vmem:[#allocation7 + $0x48] sm:$0xff] }
  0x2a   :  { %2312 = vmatprep.subr.mxu0 %v3156_v1  ;;  %2346 = vmatpush3.msra.mxu1 %v3225_v6  ;;  %v3257_v14 = vld [vmem:[#allocation5 + $0x58] sm:$0xff]  ;;  %v3265_v16 = vld [vmem:[#allocation5 + $0x50] sm:$0xff]  ;;  %v3268_v17 = vld [vmem:[#allocation7 + $0x40] sm:$0xff]  ;;  %vm67_vm4 = vcmp.lt.s32.totalorder %v3350_v37, 16 }
  0x2b   :  { %2313 = vmatpush3.msra.mxu0 %v3221_v5  ;;  %2347 = vmatprep.subr.mxu1 %v3156_v1  ;;  %v3273_v18 = vld [vmem:[#allocation5 + $0x48] sm:$0xff]  ;;  %v3276_v19 = vld [vmem:[#allocation7 + $0x38] sm:$0xff]  ;;  %v3281_v20 = vld [vmem:[#allocation5 + $0x40] sm:$0xff] }
  0x2c   :  { %2314 = vmatprep.subr.mxu0 %v3156_v1  ;;  %2348 = vmatpush3.msra.mxu1 %v3231_v8  ;;  %v3284_v21 = vld [vmem:[#allocation7 + $0x30] sm:$0xff]  ;;  %v3289_v22 = vld [vmem:[#allocation5 + $0x38] sm:$0xff]  ;;  %v3292_v23 = vld [vmem:[#allocation7 + $0x28] sm:$0xff] }
  0x2d   :  { %2955 = vset.pattern.permute.xlu0 %v4267_v2  ;;  %2315 = vmatpush3.msra.mxu0 %v3228_v7  ;;  %v3297_v24 = vld [vmem:[#allocation5 + $0x30] sm:$0xff]  ;;  %v3300_v25 = vld [vmem:[#allocation7 + $0x20] sm:$0xff]  ;;  %v3305_v26 = vld [vmem:[#allocation5 + $0x28] sm:$0xff] }
  0x2e   :  { %70 = vperm.xlu0 %2955, %v3217_v3   ;;  %2316 = vmatprep.subr.mxu0 %v3156_v1  ;;  %v3308_v27 = vld [vmem:[#allocation7 + $0x18] sm:$0xff]  ;;  %v3313_v28 = vld [vmem:[#allocation5 + $0x20] sm:$0xff]  ;;  %v3316_v29 = vld [vmem:[#allocation7 + $0x10] sm:$0xff] }
  0x2f   :  { %2317 = vmatpush3.msra.mxu0 %v3236_v9  ;;  %2349 = vmatprep.subr.mxu1 %v3156_v1  ;;  %v3321_v30 = vld [vmem:[#allocation5 + $0x18] sm:$0xff]  ;;  %v3324_v31 = vld [vmem:[#allocation7 + $0x8] sm:$0xff]  ;;  %v3329_v32 = vld [vmem:[#allocation5 + $0x10] sm:$0xff] }
  0x30   :  { %2318 = vmatprep.subr.mxu0 %v3156_v1  ;;  %2350 = vmatpush3.msra.mxu1 %v3241_v10  ;;  %v3332_v33 = vld [vmem:[#allocation7] sm:$0xff]  ;;  %v3337_v34 = vld [vmem:[#allocation5 + $0x8] sm:$0xff]  ;;  %v3369_v41 = vld [vmem:[%s4265_s4] sm:$0xff]  }
  0x31   :  { %2319 = vmatpush3.msra.mxu0 %v3245_v11  ;;  %2351 = vmatprep.subr.mxu1 %v3156_v1  ;;  %v3343_v35 = vld [vmem:[#allocation5] sm:$0xff] }
  0x32   :  { %2320 = vmatprep.subr.mxu0 %v3156_v1  ;;  %2352 = vmatpush3.msra.mxu1 %v3249_v12  ;;  %v3355_v38 = vld [vmem:[%s4265_s4 + $0x8] sm:$0xff]  }
  0x33   :  { %2321 = vmatpush3.msra.mxu0 %v3252_v13  ;;  %2353 = vmatprep.subr.mxu1 %v3156_v1 }
  0x34   :  { %2322 = vmatprep.subr.mxu0 %v3156_v1  ;;  %2354 = vmatpush3.msra.mxu1 %v3257_v14 }
  0x35   :  { %2323 = vmatpush3.msra.mxu0 %v3260_v15  ;;  %2355 = vmatprep.subr.mxu1 %v3156_v1 }
  0x36   :  { %2324 = vmatprep.subr.mxu0 %v3156_v1  ;;  %2356 = vmatpush3.msra.mxu1 %v3265_v16 }
  0x37   :  { %2325 = vmatpush3.msra.mxu0 %v3268_v17  ;;  %2357 = vmatprep.subr.mxu1 %v3156_v1 }
  0x38   :  { %2326 = vmatprep.subr.mxu0 %v3156_v1  ;;  %2358 = vmatpush3.msra.mxu1 %v3273_v18 }
  0x39   :  { %2327 = vmatpush3.msra.mxu0 %v3276_v19  ;;  %2359 = vmatprep.subr.mxu1 %v3156_v1 }
  0x3a   :  { %2328 = vmatprep.subr.mxu0 %v3156_v1  ;;  %2360 = vmatpush3.msra.mxu1 %v3281_v20 }
  0x3b   :  { %2329 = vmatpush3.msra.mxu0 %v3284_v21  ;;  %2361 = vmatprep.subr.mxu1 %v3156_v1 }
  0x3c   :  { %2330 = vmatprep.subr.mxu0 %v3156_v1  ;;  %2362 = vmatpush3.msra.mxu1 %v3289_v22 }
  0x3d   :  { %2331 = vmatpush3.msra.mxu0 %v3292_v23  ;;  %2363 = vmatprep.subr.mxu1 %v3156_v1 }
  0x3e   :  { %2332 = vmatprep.subr.mxu0 %v3156_v1  ;;  %2364 = vmatpush3.msra.mxu1 %v3297_v24 }
  0x3f   :  { %2333 = vmatpush3.msra.mxu0 %v3300_v25  ;;  %2365 = vmatprep.subr.mxu1 %v3156_v1 }
  0x40   :  { %2334 = vmatprep.subr.mxu0 %v3156_v1  ;;  %2366 = vmatpush3.msra.mxu1 %v3305_v26 }
  0x41   :  { %2335 = vmatpush3.msra.mxu0 %v3308_v27  ;;  %2367 = vmatprep.subr.mxu1 %v3156_v1 }
  0x42   :  { %2336 = vmatprep.subr.mxu0 %v3156_v1  ;;  %2368 = vmatpush3.msra.mxu1 %v3313_v28 }
  0x43   :  { %2337 = vmatpush3.msra.mxu0 %v3316_v29  ;;  %2369 = vmatprep.subr.mxu1 %v3156_v1 }
  0x44   :  { %2338 = vmatprep.subr.mxu0 %v3156_v1  ;;  %2370 = vmatpush3.msra.mxu1 %v3321_v30 }
  0x45   :  { %2339 = vmatpush3.msra.mxu0 %v3324_v31  ;;  %2371 = vmatprep.subr.mxu1 %v3156_v1 }
  0x46   :  { %2340 = vmatprep.subr.mxu0 %v3156_v1  ;;  %2372 = vmatpush3.msra.mxu1 %v3329_v32 }
  0x47   :  { %2341 = vmatpush3.msra.mxu0 %v3332_v33  ;;  %2373 = vmatprep.subr.mxu1 %v3156_v1 }
  0x48   :  { %2380 = vmatprep.subr.bf16.mxu0 %v3156_v1  ;;  %2374 = vmatpush3.msra.mxu1 %v3337_v34 }
  0x49   :  { %2375 = vmatprep.subr.mxu1 %v3156_v1  ;;  %2956 = vset.pattern.permute.xlu0 %v3161_v60 }
  0x4a   :  { %2376 = vmatpush3.msra.mxu1 %v3343_v35  ;;  %357 = vperm.xlu0 %2956, %v3217_v3  }
  0x4b   :  { %2388 = vmatprep.subr.mxu1 %v3156_v1 }
  0xa4   :  { %v3357_v39 = vpop.permute.xlu0 %92 }
  0xa5   :  { %vm94_vm1 = vcmp.eq.s32.totalorder %v3357_v39, %v3350_v37 }
  0xa6   :  { %2343 = vmatmul.mubr.msk.f32.vlgmr.msra.gmra.mxu0 %vm94_vm1, %v3159_v40 }
  0xa7   :  { %2381 = vmatpush3.bf16.msra.mxu0 %v3355_v38  ;;  %2384 = vmatprep.mubr.msk.bf16.mxu0 %vm3158_vm0, %v3156_v1 }
  0xa8   :  { %2382 = vmatprep.subr.bf16.mxu0 %v3156_v1 }
  0xa9   :  { %v3374_v42 = vpop.permute.xlu0 %70 }
  0xaa   :  { %vm72_vm2 = vcmp.eq.s32.totalorder %v3374_v42, %v3350_v37 }
  0xab   :  { %2383 = vmatpush3.bf16.msra.mxu0 %v3369_v41  ;;  %2378 = vmatmul.mubr.msk.f32.vlgmr.msra.gmra.mxu1 %vm72_vm2, %v3159_v40 }
  0xac   :  { %2389 = vmatpush3.msra.mxu1 %v3219_v4  ;;  %2423 = vmatprep.subr.mxu0 %v3156_v1 }
  0xad   :  { %2390 = vmatprep.subr.mxu1 %v3156_v1  ;;  %2420 = vmatprep.mubr.msk.f32.mxu1 %vm3158_vm0, %v3156_v1 }
  0xae   :  { %2385 = vmatmul.mubr.bf16.vlgmr.msra.gmra.mxu0 %v4267_v2  ;;  %2391 = vmatpush3.msra.mxu1 %v3221_v5 }
  0xaf   :  { %2424 = vmatpush3.msra.mxu0 %v3225_v6  ;;  %2392 = vmatprep.subr.mxu1 %v3156_v1 }
  0xb0   :  { %2425 = vmatprep.subr.mxu0 %v3156_v1  ;;  %2393 = vmatpush3.msra.mxu1 %v3228_v7 }
  0xb1   :  { %2426 = vmatpush3.msra.mxu0 %v3231_v8  ;;  %2394 = vmatprep.subr.mxu1 %v3156_v1 }
  0xb2   :  { %2427 = vmatprep.subr.mxu0 %v3156_v1  ;;  %2395 = vmatpush3.msra.mxu1 %v3236_v9 }
  0xb3   :  { %2428 = vmatpush3.msra.mxu0 %v3241_v10  ;;  %2396 = vmatprep.subr.mxu1 %v3156_v1 }
  0xb4   :  { %2429 = vmatprep.subr.mxu0 %v3156_v1  ;;  %2397 = vmatpush3.msra.mxu1 %v3245_v11 }
  0xb5   :  { %2430 = vmatpush3.msra.mxu0 %v3249_v12  ;;  %2398 = vmatprep.subr.mxu1 %v3156_v1 }
  0xb6   :  { %2431 = vmatprep.subr.mxu0 %v3156_v1  ;;  %2399 = vmatpush3.msra.mxu1 %v3252_v13 }
  0xb7   :  { %2432 = vmatpush3.msra.mxu0 %v3257_v14  ;;  %2400 = vmatprep.subr.mxu1 %v3156_v1 }
  0xb8   :  { %2433 = vmatprep.subr.mxu0 %v3156_v1  ;;  %2401 = vmatpush3.msra.mxu1 %v3260_v15 }
  0xb9   :  { %2434 = vmatpush3.msra.mxu0 %v3265_v16  ;;  %2402 = vmatprep.subr.mxu1 %v3156_v1 }
  0xba   :  { %2435 = vmatprep.subr.mxu0 %v3156_v1  ;;  %2403 = vmatpush3.msra.mxu1 %v3268_v17 }
  0xbb   :  { %2436 = vmatpush3.msra.mxu0 %v3273_v18  ;;  %2404 = vmatprep.subr.mxu1 %v3156_v1 }
  0xbc   :  { %2437 = vmatprep.subr.mxu0 %v3156_v1  ;;  %2405 = vmatpush3.msra.mxu1 %v3276_v19 }
  0xbd   :  { %2438 = vmatpush3.msra.mxu0 %v3281_v20  ;;  %2406 = vmatprep.subr.mxu1 %v3156_v1 }
  0xbe   :  { %2439 = vmatprep.subr.mxu0 %v3156_v1  ;;  %2407 = vmatpush3.msra.mxu1 %v3284_v21 }
  0xbf   :  { %2440 = vmatpush3.msra.mxu0 %v3289_v22  ;;  %2408 = vmatprep.subr.mxu1 %v3156_v1 }
  0xc0   :  { %2441 = vmatprep.subr.mxu0 %v3156_v1  ;;  %2409 = vmatpush3.msra.mxu1 %v3292_v23 }
  0xc1   :  { %2442 = vmatpush3.msra.mxu0 %v3297_v24  ;;  %2410 = vmatprep.subr.mxu1 %v3156_v1 }
  0xc2   :  { %2443 = vmatprep.subr.mxu0 %v3156_v1  ;;  %2411 = vmatpush3.msra.mxu1 %v3300_v25 }
  0xc3   :  { %2444 = vmatpush3.msra.mxu0 %v3305_v26  ;;  %2412 = vmatprep.subr.mxu1 %v3156_v1 }
  0xc4   :  { %2445 = vmatprep.subr.mxu0 %v3156_v1  ;;  %2413 = vmatpush3.msra.mxu1 %v3308_v27 }
  0xc5   :  { %2446 = vmatpush3.msra.mxu0 %v3313_v28  ;;  %2414 = vmatprep.subr.mxu1 %v3156_v1 }
  0xc6   :  { %2447 = vmatprep.subr.mxu0 %v3156_v1  ;;  %2415 = vmatpush3.msra.mxu1 %v3316_v29 }
  0xc7   :  { %2448 = vmatpush3.msra.mxu0 %v3321_v30  ;;  %2416 = vmatprep.subr.mxu1 %v3156_v1 }
  0xc8   :  { %2449 = vmatprep.subr.mxu0 %v3156_v1  ;;  %2417 = vmatpush3.msra.mxu1 %v3324_v31 }
  0xc9   :  { %2450 = vmatpush3.msra.mxu0 %v3329_v32  ;;  %2418 = vmatprep.subr.mxu1 %v3156_v1 }
  0xca   :  { %2451 = vmatprep.subr.mxu0 %v3156_v1  ;;  %2419 = vmatpush3.msra.mxu1 %v3332_v33 }
  0xcb   :  { %2452 = vmatpush3.msra.mxu0 %v3337_v34  ;;  %2455 = vmatprep.mubr.msk.f32.mxu0 %vm3158_vm0, %v3156_v1 }
  0xcc   :  { %2453 = vmatprep.subr.mxu0 %v3156_v1  ;;  %2458 = vmatprep.subr.bf16.mxu1 %v3156_v1 }
  0xcd   :  { %2454 = vmatpush3.msra.mxu0 %v3343_v35 }
  0xce   :  { %2466 = vmatprep.subr.mxu0 %v3156_v1 }
 0x166   :  { %v179_v43 = vpop.f32.mrf.mxu0 }
 0x168   :  { %v2344_v44 = vpop.f32.mrf.mxu0 }
 0x169   :  { %v4268_v44 = vmov 1  }
 0x16b   :  { %v249_v45 = vpop.f32.mrf.mxu1 }
 0x16c   :  { %v250_v46 = vadd.f32 %v249_v45, %v179_v43  ;;  %v335_v43 = vld [vmem:[%s4262_s1] sm:$0xff]  ;;  %v3462_v45 = vpop.permute.xlu0 %357  ;;  %s3166_s1 = smov 64  }
 0x16d   :  { %v2379_v47 = vpop.f32.mrf.mxu1  ;;  %vm359_vm3 = vcmp.eq.s32.totalorder %v3462_v45, %v3350_v37 }
 0x16e   :  { %v303_v48 = vpop.f32.mrf.mxu0  ;;  %2421 = vmatmul.mubr.msk.f32.vlgmr.msra.gmra.mxu1 %vm359_vm3, %v3159_v40  ;;  %v3165_v47 = vmov 2  }
 0x16f   :  { %v309_v49 = vadd.f32 %v303_v48, %v250_v46  ;;  %2459 = vmatpush3.bf16.msra.mxu1 %v3355_v38  ;;  %2462 = vmatprep.mubr.msk.bf16.mxu1 %vm3158_vm0, %v3156_v1  ;;  %v3164_v46 = vmov 5  }
 0x170   :  { %v2386_v50 = vpop.f32.mrf.mxu0  ;;  %2460 = vmatprep.subr.bf16.mxu1 %v3156_v1  ;;  %2959 = vset.pattern.permute.xlu0 %v3164_v46 }
 0x171   :  { %2966 = vtanh.f32 %v309_v49  ;;  %v1979_v54 = vmul.f32 -1.442695, %v309_v49  ;;  %v3481_v50 = vsel %vm67_vm4, 1, %v3161_v60 }
 0x172   :  { %v306_v51 = vpop.f32.mrf.mxu0 }
 0x173   :  { %2968 = vpow2.f32 %v1979_v54  ;;  %2461 = vmatpush3.bf16.msra.mxu1 %v3369_v41  ;;  %v3485_v51 = vsel %vm67_vm4, 2, %v3164_v46  ;;  %v334_v54 = vsel %vm67_vm4, 0, %v3155_v0 }
 0x174   :  { %v2387_v52 = vpop.f32.mrf.mxu0  ;;  %2501 = vmatprep.subr.mxu1 %v3156_v1 }
 0x175   :  { %v3489_v52 = vsel %vm67_vm4, 5, %v3165_v47 }
 0x17e   :  { %v2967_v53 = vpop.eup %2966 }
 0x17f   :  { %319 = vrot.lane.b32.xlu1 %v2967_v53, %s3160_s11 }
 0x180   :  { %v2969_v55 = vpop.eup %2968 }
 0x181   :  { %v313_v56 = vadd.f32 1.0, %v2969_v55 }
 0x183   :  { %2970 = vrcp.f32 %v313_v56 }
 0x190   :  { %v2971_v57 = vpop.eup %2970 }
 0x191   :  { %v317_v61 = vmul.f32 0.0, %v2971_v57 }
 0x1f1   :  { %v320_v58 = vpop.permute.xlu1 %319 }
 0x1f2   :  { %v322_v59 = vmul.f32 %v2971_v57, %v320_v58 }
 0x1f4   :  { %324 = vrot.lane.b32.xlu1 %v322_v59, %s3160_s11 }
 0x266   :  { %v325_v62 = vpop.permute.xlu1 %324 }
 0x267   :  { %v327_v63 = vadd.f32 %v325_v62, %v317_v61 }
 0x269   :  { %2972 = vtanh.f32 %v327_v63 }
 0x276   :  { %v2973_v36 = vpop.eup %2972 }
 0x277   :  { %330 = vrot.lane.b32.xlu1 %v2973_v36, %s3160_s11 }
 0x27b   :  { %337 = vperm.xlu1 %2957, %v335_v43  }
 0x27f   :  { %2958 = vset.pattern.permute.xlu1 %v4268_v44 }
 0x280   :  { %351 = vperm.xlu1 %2958, %v3217_v3  }
 0x284   :  { %346 = vrot.lane.b32.xlu1 %v327_v63, %s3163_s14 }
 0x285   :  { %2960 = vset.pattern.permute.xlu1 %v3165_v47 }
 0x2e9   :  { %v331_v48 = vpop.permute.xlu1 %330 }
 0x2ea   :  { %v333_v49 = vmul.f32 %v2971_v57, %v331_v48  ;;  %v428_v57 = vpop.f32.mrf.mxu1 }
 0x2ec   :  { %341 = vrot.lane.b32.xlu0 %v333_v49, %s3166_s1  ;;  %v2422_v58 = vpop.f32.mrf.mxu1 }
 0x2f6   :  { %v3491_v53 = vpop.permute.xlu1 %337 }
 0x2f7   :  { %vm813_vm5 = vcmp.lt.s32.totalorder %v3485_v51, %v3491_v53  ;;  %vm1500_vm6 = vcmp.lt.s32.totalorder %v3489_v52, %v3491_v53  ;;  %vm576_vm7 = vcmp.lt.s32.totalorder %v3481_v50, %v3491_v53  ;;  %vm339_vm9 = vcmp.lt.s32.totalorder %v334_v54, %v3491_v53  ;;  %v3894_v51 = vld [vmem:[#allocation7 + $0x20] sm:$0xff] }
 0x2fb   :  { %v3502_v55 = vpop.permute.xlu1 %351 }
 0x2fc   :  { %vm353_vm8 = vcmp.eq.s32.totalorder %v3502_v55, %v3350_v37 }
 0x2fd   :  { %2456 = vmatmul.mubr.msk.f32.vlgmr.msra.gmra.mxu0 %vm353_vm8, %v3159_v40 }
 0x2fe   :  { %2467 = vmatpush3.msra.mxu0 %v3219_v4  ;;  %2498 = vmatprep.mubr.msk.f32.mxu0 %vm3158_vm0, %v3156_v1 }
 0x2ff   :  { %v347_v56 = vpop.permute.xlu1 %346  ;;  %2468 = vmatprep.subr.mxu0 %v3156_v1 }
 0x300   :  { %v3517_v0 = vsel %vm339_vm9, %v347_v56, 0.0  ;;  %2469 = vmatpush3.msra.mxu0 %v3221_v5 }
 0x301   :  { %555 = vrot.lane.b32.xlu1 %v3517_v0, %s3160_s11  ;;  %2470 = vmatprep.subr.mxu0 %v3156_v1 }
 0x302   :  { %2471 = vmatpush3.msra.mxu0 %v3228_v7 }
 0x303   :  { %2472 = vmatprep.subr.mxu0 %v3156_v1 }
 0x304   :  { %2473 = vmatpush3.msra.mxu0 %v3236_v9 }
 0x305   :  { %2474 = vmatprep.subr.mxu0 %v3156_v1 }
 0x306   :  { %2475 = vmatpush3.msra.mxu0 %v3245_v11 }
 0x307   :  { %2476 = vmatprep.subr.mxu0 %v3156_v1 }
 0x308   :  { %2477 = vmatpush3.msra.mxu0 %v3252_v13 }
 0x309   :  { %2478 = vmatprep.subr.mxu0 %v3156_v1 }
 0x30a   :  { %2479 = vmatpush3.msra.mxu0 %v3260_v15 }
 0x30b   :  { %2480 = vmatprep.subr.mxu0 %v3156_v1 }
 0x30c   :  { %2481 = vmatpush3.msra.mxu0 %v3268_v17 }
 0x30d   :  { %2482 = vmatprep.subr.mxu0 %v3156_v1 }
 0x30e   :  { %2483 = vmatpush3.msra.mxu0 %v3276_v19 }
 0x30f   :  { %2484 = vmatprep.subr.mxu0 %v3156_v1 }
 0x310   :  { %2485 = vmatpush3.msra.mxu0 %v3284_v21 }
 0x311   :  { %2486 = vmatprep.subr.mxu0 %v3156_v1 }
 0x312   :  { %2487 = vmatpush3.msra.mxu0 %v3292_v23 }
 0x313   :  { %2488 = vmatprep.subr.mxu0 %v3156_v1 }
 0x314   :  { %2489 = vmatpush3.msra.mxu0 %v3300_v25 }
 0x315   :  { %2490 = vmatprep.subr.mxu0 %v3156_v1 }
 0x316   :  { %2491 = vmatpush3.msra.mxu0 %v3308_v27 }
 0x317   :  { %2492 = vmatprep.subr.mxu0 %v3156_v1 }
 0x318   :  { %2493 = vmatpush3.msra.mxu0 %v3316_v29 }
 0x319   :  { %2494 = vmatprep.subr.mxu0 %v3156_v1 }
 0x31a   :  { %2495 = vmatpush3.msra.mxu0 %v3324_v31 }
 0x31b   :  { %2496 = vmatprep.subr.mxu0 %v3156_v1 }
 0x31c   :  { %2497 = vmatpush3.msra.mxu0 %v3332_v33 }
 0x31d   :  { %2536 = vmatprep.subr.bf16.mxu0 %v3156_v1 }
 0x35e   :  { %v342_v59 = vpop.permute.xlu0 %341 }
 0x35f   :  { %v3553_v60 = vsel %vm339_vm9, %v342_v59, 0.0 }
 0x360   :  { %v502_v61 = vpack.c.bf16 %v3553_v60, %v3553_v60 }
 0x362   :  { %2463 = vmatmul.mubr.msk.bf16.vlgmr.msra.gmra.mxu1 %vm265_vm10, %v502_v61 }
 0x363   :  { %2502 = vmatpush3.msra.mxu1 %v3225_v6  ;;  %2533 = vmatprep.mubr.msk.f32.mxu1 %vm3158_vm0, %v3156_v1 }
 0x364   :  { %2503 = vmatprep.subr.mxu1 %v3156_v1 }
 0x365   :  { %2504 = vmatpush3.msra.mxu1 %v3231_v8 }
 0x366   :  { %2505 = vmatprep.subr.mxu1 %v3156_v1 }
 0x367   :  { %2506 = vmatpush3.msra.mxu1 %v3241_v10 }
 0x368   :  { %2507 = vmatprep.subr.mxu1 %v3156_v1 }
 0x369   :  { %2508 = vmatpush3.msra.mxu1 %v3249_v12 }
 0x36a   :  { %2509 = vmatprep.subr.mxu1 %v3156_v1 }
 0x36b   :  { %2510 = vmatpush3.msra.mxu1 %v3257_v14 }
 0x36c   :  { %2511 = vmatprep.subr.mxu1 %v3156_v1 }
 0x36d   :  { %2512 = vmatpush3.msra.mxu1 %v3265_v16 }
 0x36e   :  { %2513 = vmatprep.subr.mxu1 %v3156_v1 }
 0x36f   :  { %2514 = vmatpush3.msra.mxu1 %v3273_v18 }
 0x370   :  { %2515 = vmatprep.subr.mxu1 %v3156_v1 }
 0x371   :  { %2516 = vmatpush3.msra.mxu1 %v3281_v20 }
 0x372   :  { %2517 = vmatprep.subr.mxu1 %v3156_v1 }
 0x373   :  { %2518 = vmatpush3.msra.mxu1 %v3289_v22 }
 0x374   :  { %2519 = vmatprep.subr.mxu1 %v3156_v1 }
 0x375   :  { %2520 = vmatpush3.msra.mxu1 %v3297_v24 }
 0x376   :  { %2521 = vmatprep.subr.mxu1 %v3156_v1 }
 0x377   :  { %2522 = vmatpush3.msra.mxu1 %v3305_v26 }
 0x378   :  { %2523 = vmatprep.subr.mxu1 %v3156_v1 }
 0x379   :  { %2524 = vmatpush3.msra.mxu1 %v3313_v28 }
 0x37a   :  { %2525 = vmatprep.subr.mxu1 %v3156_v1 }
 0x37b   :  { %2526 = vmatpush3.msra.mxu1 %v3321_v30 }
 0x37c   :  { %2527 = vmatprep.subr.mxu1 %v3156_v1 }
 0x37d   :  { %2528 = vmatpush3.msra.mxu1 %v3329_v32 }
 0x37e   :  { %2529 = vmatprep.subr.mxu1 %v3156_v1 }
 0x37f   :  { %2530 = vmatpush3.msra.mxu1 %v3337_v34 }
 0x380   :  { %2531 = vmatprep.subr.mxu1 %v3156_v1 }
 0x381   :  { %2532 = vmatpush3.msra.mxu1 %v3343_v35 }
 0x382   :  { %2544 = vmatprep.subr.mxu1 %v3156_v1 }
 0x3bd   :  { %v498_v62 = vpop.f32.mrf.mxu0 }
 0x3be   :  { %v499_v36 = vadd.f32 %v498_v62, %v428_v57  ;;  %v3167_v57 = vmov 3   ;;  %v556_v62 = vpop.permute.xlu1 %555 }
 0x3bf   :  { %v2457_v63 = vpop.f32.mrf.mxu0 }
 0x422   :  { %v540_v43 = vpop.f32.mrf.mxu1 }
 0x423   :  { %v546_v46 = vadd.f32 %v540_v43, %v499_v36 }
 0x424   :  { %v2464_v47 = vpop.f32.mrf.mxu1 }
 0x425   :  { %2974 = vtanh.f32 %v546_v46  ;;  %v1985_v56 = vmul.f32 -1.442695, %v546_v46 }
 0x426   :  { %v543_v48 = vpop.f32.mrf.mxu1 }
 0x427   :  { %2976 = vpow2.f32 %v1985_v56 }
 0x428   :  { %v2465_v49 = vpop.f32.mrf.mxu1 }
 0x432   :  { %v2975_v54 = vpop.eup %2974 }
 0x433   :  { %560 = vrot.lane.b32.xlu0 %v2975_v54, %s3160_s11 }
 0x434   :  { %v2977_v58 = vpop.eup %2976 }
 0x435   :  { %v550_v59 = vadd.f32 1.0, %v2977_v58 }
 0x437   :  { %2978 = vrcp.f32 %v550_v59 }
 0x444   :  { %v2979_v61 = vpop.eup %2978 }
 0x445   :  { %v558_v63 = vmul.f32 %v2979_v61, %v556_v62 }
 0x4a5   :  { %v561_v2 = vpop.permute.xlu0 %560 }
 0x4a6   :  { %v563_v44 = vmul.f32 %v2979_v61, %v561_v2 }
 0x4a8   :  { %565 = vrot.lane.b32.xlu0 %v563_v44, %s3160_s11  ;;  %v3168_v44 = vmov 4  }
 0x4ac   :  { %594 = vperm.xlu0 %2959, %v3217_v3  }
 0x4b0   :  { %2962 = vset.pattern.permute.xlu0 %v3167_v57 }
 0x51a   :  { %v566_v36 = vpop.permute.xlu0 %565 }
 0x51b   :  { %v568_v43 = vadd.f32 %v566_v36, %v558_v63 }
 0x51d   :  { %2980 = vtanh.f32 %v568_v43  ;;  %583 = vrot.lane.b32.xlu0 %v568_v43, %s3163_s14 }
 0x527   :  { %v3597_v46 = vpop.permute.xlu0 %594 }
 0x528   :  { %vm596_vm11 = vcmp.eq.s32.totalorder %v3597_v46, %v3350_v37  ;;  %v4048_v46 = vld [vmem:[%s4265_s4 + $0x8] sm:$0xff]  }
 0x529   :  { %2499 = vmatmul.mubr.msk.f32.vlgmr.msra.gmra.mxu0 %vm596_vm11, %v3159_v40 }
 0x52a   :  { %v2981_v2 = vpop.eup %2980  ;;  %2537 = vmatpush3.bf16.msra.mxu0 %v3355_v38  ;;  %2540 = vmatprep.mubr.msk.bf16.mxu0 %vm3158_vm0, %v3156_v1 }
 0x52b   :  { %571 = vrot.lane.b32.xlu1 %v2981_v2, %s3160_s11  ;;  %2538 = vmatprep.subr.bf16.mxu0 %v3156_v1 }
 0x52e   :  { %2539 = vmatpush3.bf16.msra.mxu0 %v3369_v41 }
 0x52f   :  { %588 = vperm.xlu1 %2960, %v3217_v3   ;;  %2579 = vmatprep.subr.mxu0 %v3156_v1 }
 0x533   :  { %2961 = vset.pattern.permute.xlu1 %v3168_v44 }
 0x58f   :  { %v584_v47 = vpop.permute.xlu0 %583 }
 0x590   :  { %v3618_v48 = vsel %vm576_vm7, %v584_v47, %v3517_v0 }
 0x591   :  { %792 = vrot.lane.b32.xlu0 %v3618_v48, %s3160_s11 }
 0x59d   :  { %v572_v49 = vpop.permute.xlu1 %571 }
 0x59e   :  { %v574_v54 = vmul.f32 %v2979_v61, %v572_v49 }
 0x5a0   :  { %578 = vrot.lane.b32.xlu1 %v574_v54, %s3166_s1 }
 0x5aa   :  { %v3623_v56 = vpop.permute.xlu1 %588 }
 0x5ab   :  { %vm590_vm12 = vcmp.eq.s32.totalorder %v3623_v56, %v3350_v37 }
 0x5ac   :  { %2534 = vmatmul.mubr.msk.f32.vlgmr.msra.gmra.mxu1 %vm590_vm12, %v3159_v40 }
 0x5ad   :  { %2545 = vmatpush3.msra.mxu1 %v3219_v4  ;;  %2576 = vmatprep.mubr.msk.f32.mxu1 %vm3158_vm0, %v3156_v1 }
 0x5ae   :  { %2546 = vmatprep.subr.mxu1 %v3156_v1 }
 0x5af   :  { %2547 = vmatpush3.msra.mxu1 %v3221_v5 }
 0x5b0   :  { %2548 = vmatprep.subr.mxu1 %v3156_v1 }
 0x5b1   :  { %2549 = vmatpush3.msra.mxu1 %v3228_v7 }
 0x5b2   :  { %2550 = vmatprep.subr.mxu1 %v3156_v1 }
 0x5b3   :  { %2551 = vmatpush3.msra.mxu1 %v3236_v9 }
 0x5b4   :  { %2552 = vmatprep.subr.mxu1 %v3156_v1 }
 0x5b5   :  { %2553 = vmatpush3.msra.mxu1 %v3245_v11 }
 0x5b6   :  { %2554 = vmatprep.subr.mxu1 %v3156_v1 }
 0x5b7   :  { %2555 = vmatpush3.msra.mxu1 %v3252_v13 }
 0x5b8   :  { %2556 = vmatprep.subr.mxu1 %v3156_v1 }
 0x5b9   :  { %2557 = vmatpush3.msra.mxu1 %v3260_v15 }
 0x5ba   :  { %2558 = vmatprep.subr.mxu1 %v3156_v1 }
 0x5bb   :  { %2559 = vmatpush3.msra.mxu1 %v3268_v17 }
 0x5bc   :  { %2560 = vmatprep.subr.mxu1 %v3156_v1 }
 0x5bd   :  { %2561 = vmatpush3.msra.mxu1 %v3276_v19 }
 0x5be   :  { %2562 = vmatprep.subr.mxu1 %v3156_v1 }
 0x5bf   :  { %2563 = vmatpush3.msra.mxu1 %v3284_v21 }
 0x5c0   :  { %2564 = vmatprep.subr.mxu1 %v3156_v1 }
 0x5c1   :  { %2565 = vmatpush3.msra.mxu1 %v3292_v23 }
 0x5c2   :  { %2566 = vmatprep.subr.mxu1 %v3156_v1 }
 0x5c3   :  { %2567 = vmatpush3.msra.mxu1 %v3300_v25 }
 0x5c4   :  { %2568 = vmatprep.subr.mxu1 %v3156_v1 }
 0x5c5   :  { %2569 = vmatpush3.msra.mxu1 %v3308_v27 }
 0x5c6   :  { %2570 = vmatprep.subr.mxu1 %v3156_v1 }
 0x5c7   :  { %2571 = vmatpush3.msra.mxu1 %v3316_v29 }
 0x5c8   :  { %2572 = vmatprep.subr.mxu1 %v3156_v1 }
 0x5c9   :  { %2573 = vmatpush3.msra.mxu1 %v3324_v31 }
 0x5ca   :  { %2574 = vmatprep.subr.mxu1 %v3156_v1 }
 0x5cb   :  { %2575 = vmatpush3.msra.mxu1 %v3332_v33 }
 0x5cc   :  { %2614 = vmatprep.subr.bf16.mxu1 %v3156_v1 }
 0x5e9   :  { %v665_v0 = vpop.f32.mrf.mxu0 }
 0x5eb   :  { %v2500_v58 = vpop.f32.mrf.mxu0 }
 0x603   :  { %v793_v54 = vpop.permute.xlu0 %792 }
 0x612   :  { %v579_v59 = vpop.permute.xlu1 %578 }
 0x613   :  { %v3669_v61 = vsel %vm576_vm7, %v579_v59, %v3553_v60 }
 0x614   :  { %v739_v62 = vpack.c.bf16 %v3669_v61, %v3669_v61 }
 0x616   :  { %2541 = vmatmul.mubr.msk.bf16.vlgmr.msra.gmra.mxu0 %vm265_vm10, %v739_v62 }
 0x617   :  { %2580 = vmatpush3.msra.mxu0 %v3225_v6  ;;  %2611 = vmatprep.mubr.msk.f32.mxu0 %vm3158_vm0, %v3156_v1 }
 0x618   :  { %2581 = vmatprep.subr.mxu0 %v3156_v1 }
 0x619   :  { %2582 = vmatpush3.msra.mxu0 %v3231_v8 }
 0x61a   :  { %2583 = vmatprep.subr.mxu0 %v3156_v1 }
 0x61b   :  { %2584 = vmatpush3.msra.mxu0 %v3241_v10 }
 0x61c   :  { %2585 = vmatprep.subr.mxu0 %v3156_v1 }
 0x61d   :  { %2586 = vmatpush3.msra.mxu0 %v3249_v12 }
 0x61e   :  { %2587 = vmatprep.subr.mxu0 %v3156_v1 }
 0x61f   :  { %2588 = vmatpush3.msra.mxu0 %v3257_v14 }
 0x620   :  { %2589 = vmatprep.subr.mxu0 %v3156_v1 }
 0x621   :  { %2590 = vmatpush3.msra.mxu0 %v3265_v16 }
 0x622   :  { %2591 = vmatprep.subr.mxu0 %v3156_v1 }
 0x623   :  { %2592 = vmatpush3.msra.mxu0 %v3273_v18 }
 0x624   :  { %2593 = vmatprep.subr.mxu0 %v3156_v1 }
 0x625   :  { %2594 = vmatpush3.msra.mxu0 %v3281_v20 }
 0x626   :  { %2595 = vmatprep.subr.mxu0 %v3156_v1 }
 0x627   :  { %2596 = vmatpush3.msra.mxu0 %v3289_v22 }
 0x628   :  { %2597 = vmatprep.subr.mxu0 %v3156_v1 }
 0x629   :  { %2598 = vmatpush3.msra.mxu0 %v3297_v24 }
 0x62a   :  { %2599 = vmatprep.subr.mxu0 %v3156_v1 }
 0x62b   :  { %2600 = vmatpush3.msra.mxu0 %v3305_v26 }
 0x62c   :  { %2601 = vmatprep.subr.mxu0 %v3156_v1 }
 0x62d   :  { %2602 = vmatpush3.msra.mxu0 %v3313_v28 }
 0x62e   :  { %2603 = vmatprep.subr.mxu0 %v3156_v1 }
 0x62f   :  { %2604 = vmatpush3.msra.mxu0 %v3321_v30 }
 0x630   :  { %2605 = vmatprep.subr.mxu0 %v3156_v1 }
 0x631   :  { %2606 = vmatpush3.msra.mxu0 %v3329_v32 }
 0x632   :  { %2607 = vmatprep.subr.mxu0 %v3156_v1 }
 0x633   :  { %2608 = vmatpush3.msra.mxu0 %v3337_v34 }
 0x634   :  { %2609 = vmatprep.subr.mxu0 %v3156_v1 }
 0x635   :  { %2610 = vmatpush3.msra.mxu0 %v3343_v35 }
 0x636   :  { %2622 = vmatprep.subr.mxu0 %v3156_v1 }
 0x66c   :  { %v735_v6 = vpop.f32.mrf.mxu1 }
 0x66d   :  { %v736_v10 = vadd.f32 %v735_v6, %v665_v0 }
 0x66e   :  { %v2535_v8 = vpop.f32.mrf.mxu1 }
 0x6d6   :  { %v777_v12 = vpop.f32.mrf.mxu0 }
 0x6d7   :  { %v783_v14 = vadd.f32 %v777_v12, %v736_v10  ;;  %v3906_v12 = vld [vmem:[#allocation7 + $0x8] sm:$0xff] }
 0x6d8   :  { %v2542_v16 = vpop.f32.mrf.mxu0 }
 0x6d9   :  { %2982 = vtanh.f32 %v783_v14  ;;  %v1991_v63 = vmul.f32 -1.442695, %v783_v14  ;;  %v3910_v14 = vld [vmem:[#allocation7] sm:$0xff] }
 0x6da   :  { %v780_v18 = vpop.f32.mrf.mxu0 }
 0x6db   :  { %2984 = vpow2.f32 %v1991_v63 }
 0x6dc   :  { %v2543_v50 = vpop.f32.mrf.mxu0 }
 0x6e6   :  { %v2983_v60 = vpop.eup %2982 }
 0x6e7   :  { %797 = vrot.lane.b32.xlu1 %v2983_v60, %s3160_s11 }
 0x6e8   :  { %v2985_v36 = vpop.eup %2984 }
 0x6e9   :  { %v787_v43 = vadd.f32 1.0, %v2985_v36 }
 0x6eb   :  { %2986 = vrcp.f32 %v787_v43 }
 0x6f8   :  { %v2987_v2 = vpop.eup %2986 }
 0x6f9   :  { %v795_v0 = vmul.f32 %v2987_v2, %v793_v54 }
 0x759   :  { %v798_v47 = vpop.permute.xlu1 %797 }
 0x75a   :  { %v800_v49 = vmul.f32 %v2987_v2, %v798_v47 }
 0x75c   :  { %802 = vrot.lane.b32.xlu1 %v800_v49, %s3160_s11 }
 0x760   :  { %831 = vperm.xlu1 %2961, %v3217_v3  }
 0x7ce   :  { %v803_v58 = vpop.permute.xlu1 %802 }
 0x7cf   :  { %v805_v59 = vadd.f32 %v803_v58, %v795_v0 }
 0x7d1   :  { %2988 = vtanh.f32 %v805_v59 }
 0x7db   :  { %v3714_v6 = vpop.permute.xlu1 %831 }
 0x7dc   :  { %vm833_vm13 = vcmp.eq.s32.totalorder %v3714_v6, %v3350_v37 }
 0x7dd   :  { %2577 = vmatmul.mubr.msk.f32.vlgmr.msra.gmra.mxu1 %vm833_vm13, %v3159_v40 }
 0x7de   :  { %v2989_v62 = vpop.eup %2988  ;;  %2615 = vmatpush3.bf16.msra.mxu1 %v3355_v38  ;;  %2618 = vmatprep.mubr.msk.bf16.mxu1 %vm3158_vm0, %v3156_v1 }
 0x7df   :  { %808 = vrot.lane.b32.xlu0 %v2989_v62, %s3160_s11  ;;  %2616 = vmatprep.subr.bf16.mxu1 %v3156_v1 }
 0x7e2   :  { %2617 = vmatpush3.bf16.msra.mxu1 %v3369_v41 }
 0x7e3   :  { %825 = vperm.xlu0 %2962, %v3217_v3   ;;  %2657 = vmatprep.subr.mxu1 %v3156_v1 }
 0x7e7   :  { %2963 = vset.pattern.permute.xlu0 %v3168_v44 }
 0x851   :  { %v809_v3 = vpop.permute.xlu0 %808 }
 0x852   :  { %v811_v8 = vmul.f32 %v2987_v2, %v809_v3 }
 0x854   :  { %815 = vrot.lane.b32.xlu1 %v811_v8, %s3166_s1 }
 0x858   :  { %820 = vrot.lane.b32.xlu1 %v805_v59, %s3163_s14 }
 0x85e   :  { %v826_v10 = vpop.permute.xlu0 %825 }
 0x85f   :  { %vm827_vm14 = vcmp.eq.s32.totalorder %v826_v10, %v3350_v37 }
 0x860   :  { %2612 = vmatmul.mubr.msk.f32.vlgmr.msra.gmra.mxu0 %vm827_vm14, %v3159_v40 }
 0x861   :  { %2623 = vmatpush3.msra.mxu0 %v3219_v4  ;;  %2654 = vmatprep.mubr.msk.f32.mxu0 %vm3158_vm0, %v3156_v1 }
 0x862   :  { %2624 = vmatprep.subr.mxu0 %v3156_v1 }
 0x863   :  { %2625 = vmatpush3.msra.mxu0 %v3221_v5 }
 0x864   :  { %2626 = vmatprep.subr.mxu0 %v3156_v1 }
 0x865   :  { %2627 = vmatpush3.msra.mxu0 %v3228_v7 }
 0x866   :  { %2628 = vmatprep.subr.mxu0 %v3156_v1 }
 0x867   :  { %2629 = vmatpush3.msra.mxu0 %v3236_v9 }
 0x868   :  { %2630 = vmatprep.subr.mxu0 %v3156_v1 }
 0x869   :  { %2631 = vmatpush3.msra.mxu0 %v3245_v11 }
 0x86a   :  { %2632 = vmatprep.subr.mxu0 %v3156_v1 }
 0x86b   :  { %2633 = vmatpush3.msra.mxu0 %v3252_v13 }
 0x86c   :  { %2634 = vmatprep.subr.mxu0 %v3156_v1 }
 0x86d   :  { %2635 = vmatpush3.msra.mxu0 %v3260_v15  ;;  %v3788_v15 = vld [vmem:[#allocation5 + $0x78] sm:$0xff] }
 0x86e   :  { %2636 = vmatprep.subr.mxu0 %v3156_v1 }
 0x86f   :  { %2637 = vmatpush3.msra.mxu0 %v3268_v17 }
 0x870   :  { %2638 = vmatprep.subr.mxu0 %v3156_v1 }
 0x871   :  { %2639 = vmatpush3.msra.mxu0 %v3276_v19  ;;  %v3802_v19 = vld [vmem:[#allocation5 + $0x70] sm:$0xff] }
 0x872   :  { %2640 = vmatprep.subr.mxu0 %v3156_v1 }
 0x873   :  { %2641 = vmatpush3.msra.mxu0 %v3284_v21  ;;  %v3806_v21 = vld [vmem:[#allocation5 + $0x68] sm:$0xff] }
 0x874   :  { %2642 = vmatprep.subr.mxu0 %v3156_v1 }
 0x875   :  { %2643 = vmatpush3.msra.mxu0 %v3292_v23  ;;  %v3810_v23 = vld [vmem:[#allocation5 + $0x60] sm:$0xff] }
 0x876   :  { %2644 = vmatprep.subr.mxu0 %v3156_v1 }
 0x877   :  { %2645 = vmatpush3.msra.mxu0 %v3300_v25  ;;  %v3814_v25 = vld [vmem:[#allocation5 + $0x58] sm:$0xff] }
 0x878   :  { %2646 = vmatprep.subr.mxu0 %v3156_v1 }
 0x879   :  { %2647 = vmatpush3.msra.mxu0 %v3308_v27  ;;  %v3818_v27 = vld [vmem:[#allocation5 + $0x50] sm:$0xff] }
 0x87a   :  { %2648 = vmatprep.subr.mxu0 %v3156_v1 }
 0x87b   :  { %2649 = vmatpush3.msra.mxu0 %v3316_v29  ;;  %v3822_v29 = vld [vmem:[#allocation5 + $0x48] sm:$0xff] }
 0x87c   :  { %2650 = vmatprep.subr.mxu0 %v3156_v1 }
 0x87d   :  { %2651 = vmatpush3.msra.mxu0 %v3324_v31  ;;  %v3874_v31 = vld [vmem:[#allocation7 + $0x48] sm:$0xff] }
 0x87e   :  { %2652 = vmatprep.subr.mxu0 %v3156_v1 }
 0x87f   :  { %2653 = vmatpush3.msra.mxu0 %v3332_v33  ;;  %v3882_v33 = vld [vmem:[#allocation7 + $0x38] sm:$0xff] }
 0x880   :  { %2655 = vmatmul.mubr.msk.f32.vlgmr.msra.gmra.mxu0 %vm827_vm14, %v3159_v40  ;;  %2692 = vmatprep.subr.bf16.mxu0 %v3156_v1 }
 0x881   :  { %2693 = vmatpush3.bf16.msra.mxu0 %v3355_v38  ;;  %2696 = vmatprep.mubr.msk.bf16.mxu0 %vm3158_vm0, %v3156_v1 }
 0x882   :  { %2694 = vmatprep.subr.bf16.mxu0 %v3156_v1 }
 0x885   :  { %2695 = vmatpush3.bf16.msra.mxu0 %v3369_v41 }
 0x886   :  { %2735 = vmatprep.subr.mxu0 %v3156_v1 }
 0x89d   :  { %v3777_v4 = vpop.f32.mrf.mxu1 }
 0x89f   :  { %v2578_v5 = vpop.f32.mrf.mxu1 }
 0x8c6   :  { %v816_v7 = vpop.permute.xlu1 %815 }
 0x8c7   :  { %v3783_v9 = vsel %vm813_vm5, %v816_v7, %v3669_v61  ;;  %v3902_v61 = vld [vmem:[#allocation7 + $0x10] sm:$0xff] }
 0x8c8   :  { %v976_v11 = vpack.c.bf16 %v3783_v9, %v3783_v9 }
 0x8ca   :  { %2619 = vmatmul.mubr.msk.bf16.vlgmr.msra.gmra.mxu1 %vm265_vm10, %v976_v11  ;;  %v821_v13 = vpop.permute.xlu1 %820 }
 0x8cb   :  { %2658 = vmatpush3.msra.mxu1 %v3788_v15  ;;  %v3795_v17 = vsel %vm813_vm5, %v821_v13, %v3618_v48  ;;  %2689 = vmatprep.mubr.msk.f32.mxu1 %vm3158_vm0, %v3156_v1  ;;  %v3898_v48 = vld [vmem:[#allocation7 + $0x18] sm:$0xff] }
 0x8cc   :  { %2659 = vmatprep.subr.mxu1 %v3156_v1  ;;  %1029 = vrot.lane.b32.xlu1 %v3795_v17, %s3160_s11 }
 0x8cd   :  { %2660 = vmatpush3.msra.mxu1 %v3802_v19 }
 0x8ce   :  { %2661 = vmatprep.subr.mxu1 %v3156_v1 }
 0x8cf   :  { %2662 = vmatpush3.msra.mxu1 %v3806_v21 }
 0x8d0   :  { %2663 = vmatprep.subr.mxu1 %v3156_v1 }
 0x8d1   :  { %2664 = vmatpush3.msra.mxu1 %v3810_v23 }
 0x8d2   :  { %2665 = vmatprep.subr.mxu1 %v3156_v1 }
 0x8d3   :  { %2666 = vmatpush3.msra.mxu1 %v3814_v25 }
 0x8d4   :  { %2667 = vmatprep.subr.mxu1 %v3156_v1 }
 0x8d5   :  { %2668 = vmatpush3.msra.mxu1 %v3818_v27 }
 0x8d6   :  { %2669 = vmatprep.subr.mxu1 %v3156_v1 }
 0x8d7   :  { %2670 = vmatpush3.msra.mxu1 %v3822_v29 }
 0x8d8   :  { %2671 = vmatprep.subr.mxu1 %v3156_v1 }
 0x8d9   :  { %2672 = vmatpush3.msra.mxu1 %v3281_v20  ;;  %v3848_v20 = vld [vmem:[#allocation7 + $0x78] sm:$0xff] }
 0x8da   :  { %2673 = vmatprep.subr.mxu1 %v3156_v1 }
 0x8db   :  { %2674 = vmatpush3.msra.mxu1 %v3289_v22  ;;  %v3854_v22 = vld [vmem:[#allocation7 + $0x70] sm:$0xff] }
 0x8dc   :  { %2675 = vmatprep.subr.mxu1 %v3156_v1 }
 0x8dd   :  { %2676 = vmatpush3.msra.mxu1 %v3297_v24  ;;  %v3858_v24 = vld [vmem:[#allocation7 + $0x68] sm:$0xff] }
 0x8de   :  { %2677 = vmatprep.subr.mxu1 %v3156_v1 }
 0x8df   :  { %2678 = vmatpush3.msra.mxu1 %v3305_v26  ;;  %v3862_v26 = vld [vmem:[#allocation7 + $0x60] sm:$0xff] }
 0x8e0   :  { %2679 = vmatprep.subr.mxu1 %v3156_v1 }
 0x8e1   :  { %2680 = vmatpush3.msra.mxu1 %v3313_v28  ;;  %v3866_v28 = vld [vmem:[#allocation7 + $0x58] sm:$0xff] }
 0x8e2   :  { %2681 = vmatprep.subr.mxu1 %v3156_v1 }
 0x8e3   :  { %2682 = vmatpush3.msra.mxu1 %v3321_v30  ;;  %v3870_v30 = vld [vmem:[#allocation7 + $0x50] sm:$0xff] }
 0x8e4   :  { %2683 = vmatprep.subr.mxu1 %v3156_v1 }
 0x8e5   :  { %2684 = vmatpush3.msra.mxu1 %v3329_v32  ;;  %v3878_v32 = vld [vmem:[#allocation7 + $0x40] sm:$0xff] }
 0x8e6   :  { %2685 = vmatprep.subr.mxu1 %v3156_v1 }
 0x8e7   :  { %2686 = vmatpush3.msra.mxu1 %v3337_v34  ;;  %v3886_v34 = vld [vmem:[#allocation7 + $0x30] sm:$0xff] }
 0x8e8   :  { %2687 = vmatprep.subr.mxu1 %v3156_v1 }
 0x8e9   :  { %2688 = vmatpush3.msra.mxu1 %v3343_v35  ;;  %v3890_v35 = vld [vmem:[#allocation7 + $0x28] sm:$0xff] }
 0x8ea   :  { %2690 = vmatmul.mubr.msk.f32.vlgmr.msra.gmra.mxu1 %vm833_vm13, %v3159_v40  ;;  %2700 = vmatprep.subr.mxu1 %v3156_v1 }
 0x8eb   :  { %2701 = vmatpush3.msra.mxu1 %v3848_v20  ;;  %2732 = vmatprep.mubr.msk.f32.mxu1 %vm3158_vm0, %v3156_v1 }
 0x8ec   :  { %2702 = vmatprep.subr.mxu1 %v3156_v1 }
 0x8ed   :  { %2703 = vmatpush3.msra.mxu1 %v3854_v22 }
 0x8ee   :  { %2704 = vmatprep.subr.mxu1 %v3156_v1 }
 0x8ef   :  { %2705 = vmatpush3.msra.mxu1 %v3858_v24 }
 0x8f0   :  { %2706 = vmatprep.subr.mxu1 %v3156_v1 }
 0x8f1   :  { %2707 = vmatpush3.msra.mxu1 %v3862_v26 }
 0x8f2   :  { %2708 = vmatprep.subr.mxu1 %v3156_v1 }
 0x8f3   :  { %2709 = vmatpush3.msra.mxu1 %v3866_v28 }
 0x8f4   :  { %2710 = vmatprep.subr.mxu1 %v3156_v1 }
 0x8f5   :  { %2711 = vmatpush3.msra.mxu1 %v3870_v30 }
 0x8f6   :  { %2712 = vmatprep.subr.mxu1 %v3156_v1 }
 0x8f7   :  { %2713 = vmatpush3.msra.mxu1 %v3874_v31 }
 0x8f8   :  { %2714 = vmatprep.subr.mxu1 %v3156_v1 }
 0x8f9   :  { %2715 = vmatpush3.msra.mxu1 %v3878_v32 }
 0x8fa   :  { %2716 = vmatprep.subr.mxu1 %v3156_v1 }
 0x8fb   :  { %2717 = vmatpush3.msra.mxu1 %v3882_v33 }
 0x8fc   :  { %2718 = vmatprep.subr.mxu1 %v3156_v1 }
 0x8fd   :  { %2719 = vmatpush3.msra.mxu1 %v3886_v34 }
 0x8fe   :  { %2720 = vmatprep.subr.mxu1 %v3156_v1 }
 0x8ff   :  { %2721 = vmatpush3.msra.mxu1 %v3890_v35 }
 0x900   :  { %2722 = vmatprep.subr.mxu1 %v3156_v1 }
 0x901   :  { %2723 = vmatpush3.msra.mxu1 %v3894_v51 }
 0x902   :  { %2724 = vmatprep.subr.mxu1 %v3156_v1 }
 0x903   :  { %2725 = vmatpush3.msra.mxu1 %v3898_v48 }
 0x904   :  { %2726 = vmatprep.subr.mxu1 %v3156_v1 }
 0x905   :  { %2727 = vmatpush3.msra.mxu1 %v3902_v61 }
 0x906   :  { %2728 = vmatprep.subr.mxu1 %v3156_v1 }
 0x907   :  { %2729 = vmatpush3.msra.mxu1 %v3906_v12 }
 0x908   :  { %2730 = vmatprep.subr.mxu1 %v3156_v1 }
 0x909   :  { %2731 = vmatpush3.msra.mxu1 %v3910_v14 }
 0x90a   :  { %2733 = vmatmul.mubr.msk.f32.vlgmr.msra.gmra.mxu1 %vm590_vm12, %v3159_v40  ;;  %2770 = vmatprep.subr.bf16.mxu1 %v3156_v1 }
 0x90b   :  { %2771 = vmatpush3.bf16.msra.mxu1 %v3355_v38  ;;  %2774 = vmatprep.mubr.msk.bf16.mxu1 %vm3158_vm0, %v3156_v1 }
 0x90c   :  { %2772 = vmatprep.subr.bf16.mxu1 %v3156_v1 }
 0x90f   :  { %2773 = vmatpush3.bf16.msra.mxu1 %v3369_v41 }
 0x910   :  { %2813 = vmatprep.subr.mxu1 %v3156_v1 }
 0x920   :  { %v972_v16 = vpop.f32.mrf.mxu0 }
 0x921   :  { %v973_v56 = vadd.f32 %v972_v16, %v3777_v4  ;;  %v1049_v16 = vsel %vm67_vm4, 3, %v3168_v44  ;;  %v3967_v44 = vld [vmem:[#allocation5 + $0x40] sm:$0xff] }
 0x922   :  { %v2613_v18 = vpop.f32.mrf.mxu0  ;;  %vm1050_vm15 = vcmp.lt.s32.totalorder %v1049_v16, %v3491_v53 }
 0x93e   :  { %v1030_v10 = vpop.permute.xlu1 %1029 }
 0x940   :  { %v3924_v50 = vpop.f32.mrf.mxu0 }
 0x942   :  { %v2656_v60 = vpop.f32.mrf.mxu0 }
 0x98a   :  { %v1014_v63 = vpop.f32.mrf.mxu1 }
 0x98b   :  { %v1020_v36 = vadd.f32 %v1014_v63, %v973_v56 }
 0x98c   :  { %v2620_v43 = vpop.f32.mrf.mxu1 }
 0x98d   :  { %2990 = vtanh.f32 %v1020_v36  ;;  %v1997_v58 = vmul.f32 -1.442695, %v1020_v36 }
 0x98e   :  { %v1017_v38 = vpop.f32.mrf.mxu1 }
 0x98f   :  { %2992 = vpow2.f32 %v1997_v58  ;;  %v3979_v38 = vld [vmem:[#allocation5 + $0x28] sm:$0xff]  ;;  %v3999_v58 = vld [vmem:[#allocation5] sm:$0xff] }
 0x990   :  { %v2621_v2 = vpop.f32.mrf.mxu1 }
 0x991   :  { %v3983_v2 = vld [vmem:[#allocation5 + $0x20] sm:$0xff] }
 0x99a   :  { %v2991_v47 = vpop.eup %2990 }
 0x99b   :  { %1034 = vrot.lane.b32.xlu0 %v2991_v47, %s3160_s11  ;;  %v3987_v47 = vld [vmem:[#allocation5 + $0x18] sm:$0xff] }
 0x99c   :  { %v2993_v59 = vpop.eup %2992 }
 0x99d   :  { %v1024_v62 = vadd.f32 1.0, %v2993_v59  ;;  %v4057_v59 = vld [vmem:[%s4265_s4] sm:$0xff]   ;;  %s3169_s4 = smov [#allocation8]  }
 0x99e   :  { %s1963_s19 = sshll.u32 %s3169_s4, 4  ;;  %s1964_s19 = int_to_ptr.vmem [resolvable:$true] %s1963_s19 }
 0x99f   :  { %2994 = vrcp.f32 %v1024_v62  ;;  %s3124_s20 = scalar_lea.vmem %s1964_s19, 128  ;;  %p3129_p2 = scmp.lt.s32.totalorder %s1964_s19, %s1964_s19 }
 0x9a0   :  { %p3125_p1 = scmp.ne.s32.totalorder %s1964_s19, %s3124_s20  ;;  %p3130_p3 = scmp.lt.s32.totalorder %s3124_s20, %s3124_s20 }
 0x9a2   :  { %p3131_p4 = por %p3130_p3, %p3129_p2 }
 0x9a4   :  { %p3132_p5 = pnand %p3131_p4, %p3125_p1 }
 0x9aa   :  { %v3928_v49 = vpop.f32.mrf.mxu1 }
 0x9ab   :  { %v1198_v55 = vadd.f32 %v3928_v49, %v3924_v50 }
 0x9ac   :  { %v2691_v41 = vpop.f32.mrf.mxu1  ;;  %v2995_v6 = vpop.eup %2994 }
 0x9ad   :  { %v1032_v4 = vmul.f32 %v2995_v6, %v1030_v10  ;;  %v3991_v41 = vld [vmem:[#allocation5 + $0x10] sm:$0xff] }
 0x9ca   :  { %v3930_v54 = vpop.f32.mrf.mxu1 }
 0x9cc   :  { %v2734_v0 = vpop.f32.mrf.mxu1 }
 0x9cd   :  { %v3995_v0 = vld [vmem:[#allocation5 + $0x8] sm:$0xff] }
 0xa0d   :  { %v1035_v3 = vpop.permute.xlu0 %1034 }
 0xa0e   :  { %v1037_v8 = vmul.f32 %v2995_v6, %v1035_v3 }
 0xa10   :  { %1039 = vrot.lane.b32.xlu0 %v1037_v8, %s3160_s11 }
 0xa82   :  { %v1040_v5 = vpop.permute.xlu0 %1039 }
 0xa83   :  { %v1042_v7 = vadd.f32 %v1040_v5, %v1032_v4 }
 0xa85   :  { %2996 = vtanh.f32 %v1042_v7 }
 0xa92   :  { %v2997_v11 = vpop.eup %2996 }
 0xa93   :  { %1045 = vrot.lane.b32.xlu1 %v2997_v11, %s3160_s11 }
 0xa97   :  { %1057 = vrot.lane.b32.xlu1 %v1042_v7, %s3163_s14 }
 0xb05   :  { %v1046_v13 = vpop.permute.xlu1 %1045 }
 0xb06   :  { %v1048_v18 = vmul.f32 %v2995_v6, %v1046_v13 }
 0xb08   :  { %1052 = vrot.lane.b32.xlu0 %v1048_v18, %s3166_s1 }
 0xb09   :  { %v1058_v60 = vpop.permute.xlu1 %1057 }
 0xb0a   :  { %v3941_v56 = vsel %vm1050_vm15, %v1058_v60, %v3795_v17  ;;  %v3975_v17 = vld [vmem:[#allocation5 + $0x30] sm:$0xff] }
 0xb0b   :  { %1254 = vrot.lane.b32.xlu1 %v3941_v56, %s3160_s11 }
 0xb7a   :  { %v1053_v63 = vpop.permute.xlu0 %1052 }
 0xb7b   :  { %v3946_v36 = vsel %vm1050_vm15, %v1053_v63, %v3783_v9  ;;  %v3971_v9 = vld [vmem:[#allocation5 + $0x38] sm:$0xff] }
 0xb7c   :  { %v1201_v43 = vpack.c.bf16 %v3946_v36, %v3946_v36 }
 0xb7e   :  { %2697 = vmatmul.mubr.msk.bf16.vlgmr.msra.gmra.mxu0 %vm265_vm10, %v1201_v43  ;;  %v1255_v43 = vpop.permute.xlu1 %1254 }
 0xb7f   :  { %2736 = vmatpush3.msra.mxu0 %v3788_v15  ;;  %2767 = vmatprep.mubr.msk.f32.mxu0 %vm3158_vm0, %v3156_v1 }
 0xb80   :  { %2737 = vmatprep.subr.mxu0 %v3156_v1 }
 0xb81   :  { %2738 = vmatpush3.msra.mxu0 %v3802_v19 }
 0xb82   :  { %2739 = vmatprep.subr.mxu0 %v3156_v1 }
 0xb83   :  { %2740 = vmatpush3.msra.mxu0 %v3806_v21 }
 0xb84   :  { %2741 = vmatprep.subr.mxu0 %v3156_v1 }
 0xb85   :  { %2742 = vmatpush3.msra.mxu0 %v3810_v23 }
 0xb86   :  { %2743 = vmatprep.subr.mxu0 %v3156_v1 }
 0xb87   :  { %2744 = vmatpush3.msra.mxu0 %v3814_v25 }
 0xb88   :  { %2745 = vmatprep.subr.mxu0 %v3156_v1 }
 0xb89   :  { %2746 = vmatpush3.msra.mxu0 %v3818_v27 }
 0xb8a   :  { %2747 = vmatprep.subr.mxu0 %v3156_v1 }
 0xb8b   :  { %2748 = vmatpush3.msra.mxu0 %v3822_v29 }
 0xb8c   :  { %2749 = vmatprep.subr.mxu0 %v3156_v1 }
 0xb8d   :  { %2750 = vmatpush3.msra.mxu0 %v3967_v44 }
 0xb8e   :  { %2751 = vmatprep.subr.mxu0 %v3156_v1 }
 0xb8f   :  { %2752 = vmatpush3.msra.mxu0 %v3971_v9 }
 0xb90   :  { %2753 = vmatprep.subr.mxu0 %v3156_v1 }
 0xb91   :  { %2754 = vmatpush3.msra.mxu0 %v3975_v17 }
 0xb92   :  { %2755 = vmatprep.subr.mxu0 %v3156_v1 }
 0xb93   :  { %2756 = vmatpush3.msra.mxu0 %v3979_v38 }
 0xb94   :  { %2757 = vmatprep.subr.mxu0 %v3156_v1 }
 0xb95   :  { %2758 = vmatpush3.msra.mxu0 %v3983_v2 }
 0xb96   :  { %2759 = vmatprep.subr.mxu0 %v3156_v1 }
 0xb97   :  { %2760 = vmatpush3.msra.mxu0 %v3987_v47 }
 0xb98   :  { %2761 = vmatprep.subr.mxu0 %v3156_v1 }
 0xb99   :  { %2762 = vmatpush3.msra.mxu0 %v3991_v41 }
 0xb9a   :  { %2763 = vmatprep.subr.mxu0 %v3156_v1 }
 0xb9b   :  { %2764 = vmatpush3.msra.mxu0 %v3995_v0 }
 0xb9c   :  { %2765 = vmatprep.subr.mxu0 %v3156_v1 }
 0xb9d   :  { %2766 = vmatpush3.msra.mxu0 %v3999_v58 }
 0xb9e   :  { %2768 = vmatmul.mubr.msk.f32.vlgmr.msra.gmra.mxu0 %vm596_vm11, %v3159_v40  ;;  %2778 = vmatprep.subr.mxu0 %v3156_v1 }
 0xb9f   :  { %2779 = vmatpush3.msra.mxu0 %v3848_v20  ;;  %2810 = vmatprep.mubr.msk.f32.mxu0 %vm3158_vm0, %v3156_v1 }
 0xba0   :  { %2780 = vmatprep.subr.mxu0 %v3156_v1 }
 0xba1   :  { %2781 = vmatpush3.msra.mxu0 %v3854_v22 }
 0xba2   :  { %2782 = vmatprep.subr.mxu0 %v3156_v1 }
 0xba3   :  { %2783 = vmatpush3.msra.mxu0 %v3858_v24 }
 0xba4   :  { %2784 = vmatprep.subr.mxu0 %v3156_v1 }
 0xba5   :  { %2785 = vmatpush3.msra.mxu0 %v3862_v26 }
 0xba6   :  { %2786 = vmatprep.subr.mxu0 %v3156_v1 }
 0xba7   :  { %2787 = vmatpush3.msra.mxu0 %v3866_v28 }
 0xba8   :  { %2788 = vmatprep.subr.mxu0 %v3156_v1 }
 0xba9   :  { %2789 = vmatpush3.msra.mxu0 %v3870_v30 }
 0xbaa   :  { %2790 = vmatprep.subr.mxu0 %v3156_v1 }
 0xbab   :  { %2791 = vmatpush3.msra.mxu0 %v3874_v31 }
 0xbac   :  { %2792 = vmatprep.subr.mxu0 %v3156_v1 }
 0xbad   :  { %2793 = vmatpush3.msra.mxu0 %v3878_v32 }
 0xbae   :  { %2794 = vmatprep.subr.mxu0 %v3156_v1 }
 0xbaf   :  { %2795 = vmatpush3.msra.mxu0 %v3882_v33 }
 0xbb0   :  { %2796 = vmatprep.subr.mxu0 %v3156_v1 }
 0xbb1   :  { %2797 = vmatpush3.msra.mxu0 %v3886_v34 }
 0xbb2   :  { %2798 = vmatprep.subr.mxu0 %v3156_v1 }
 0xbb3   :  { %2799 = vmatpush3.msra.mxu0 %v3890_v35 }
 0xbb4   :  { %2800 = vmatprep.subr.mxu0 %v3156_v1 }
 0xbb5   :  { %2801 = vmatpush3.msra.mxu0 %v3894_v51 }
 0xbb6   :  { %2802 = vmatprep.subr.mxu0 %v3156_v1 }
 0xbb7   :  { %2803 = vmatpush3.msra.mxu0 %v3898_v48 }
 0xbb8   :  { %2804 = vmatprep.subr.mxu0 %v3156_v1 }
 0xbb9   :  { %2805 = vmatpush3.msra.mxu0 %v3902_v61 }
 0xbba   :  { %2806 = vmatprep.subr.mxu0 %v3156_v1 }
 0xbbb   :  { %2807 = vmatpush3.msra.mxu0 %v3906_v12 }
 0xbbc   :  { %2808 = vmatprep.subr.mxu0 %v3156_v1 }
 0xbbd   :  { %2809 = vmatpush3.msra.mxu0 %v3910_v14 }
 0xbbe   :  { %2811 = vmatmul.mubr.msk.f32.vlgmr.msra.gmra.mxu0 %vm353_vm8, %v3159_v40  ;;  %2848 = vmatprep.subr.bf16.mxu0 %v3156_v1 }
 0xbbf   :  { %2849 = vmatpush3.bf16.msra.mxu0 %v4048_v46  ;;  %2852 = vmatprep.mubr.msk.bf16.mxu0 %vm3158_vm0, %v3156_v1 }
 0xbc0   :  { %2850 = vmatprep.subr.bf16.mxu0 %v3156_v1 }
 0xbc3   :  { %2851 = vmatpush3.bf16.msra.mxu0 %v4057_v59 }
 0xbc4   :  { %2891 = vmatprep.subr.mxu0 %v3156_v1 }
 0xc3e   :  { %v1239_v62 = vpop.f32.mrf.mxu0 }
 0xc3f   :  { %v1245_v6 = vadd.f32 %v1239_v62, %v1198_v55 }
 0xc40   :  { %v2698_v3 = vpop.f32.mrf.mxu0 }
 0xc41   :  { %2998 = vtanh.f32 %v1245_v6  ;;  %v2001_v16 = vmul.f32 -1.442695, %v1245_v6 }
 0xc42   :  { %v1242_v8 = vpop.f32.mrf.mxu0 }
 0xc43   :  { %3000 = vpow2.f32 %v2001_v16 }
 0xc44   :  { %v2699_v10 = vpop.f32.mrf.mxu0 }
 0xc45   :  { %v1274_v10 = vsel %vm67_vm4, 4, %v3167_v57 }
 0xc46   :  { %vm1275_vm5 = vcmp.lt.s32.totalorder %v1274_v10, %v3491_v53 }
 0xc4e   :  { %v2999_v4 = vpop.eup %2998 }
 0xc4f   :  { %1259 = vrot.lane.b32.xlu0 %v2999_v4, %s3160_s11 }
 0xc50   :  { %v3001_v18 = vpop.eup %3000 }
 0xc51   :  { %v1249_v60 = vadd.f32 1.0, %v3001_v18 }
 0xc53   :  { %3002 = vrcp.f32 %v1249_v60 }
 0xc5e   :  { %v4064_v5 = vpop.f32.mrf.mxu0 }
 0xc5f   :  { %v1423_v45 = vadd.f32 %v4064_v5, %v3930_v54 }
 0xc60   :  { %v2769_v7 = vpop.f32.mrf.mxu0  ;;  %v3003_v50 = vpop.eup %3002 }
 0xc61   :  { %v1257_v55 = vmul.f32 %v3003_v50, %v1255_v43 }
 0xc7e   :  { %v4066_v11 = vpop.f32.mrf.mxu0 }
 0xc80   :  { %v2812_v13 = vpop.f32.mrf.mxu0 }
 0xcc1   :  { %v1260_v49 = vpop.permute.xlu0 %1259 }
 0xcc2   :  { %v1262_v63 = vmul.f32 %v3003_v50, %v1260_v49 }
 0xcc4   :  { %1264 = vrot.lane.b32.xlu0 %v1262_v63, %s3160_s11 }
 0xd36   :  { %v1265_v62 = vpop.permute.xlu0 %1264 }
 0xd37   :  { %v1267_v3 = vadd.f32 %v1265_v62, %v1257_v55  ;;  %v4269_v55 = vmov 1  }
 0xd38   :  { %v1724_v62 = vsel %vm67_vm4, 6, %v4269_v55 }
 0xd39   :  { %3004 = vtanh.f32 %v1267_v3 }
 0xd46   :  { %v3005_v8 = vpop.eup %3004 }
 0xd47   :  { %1270 = vrot.lane.b32.xlu1 %v3005_v8, %s3160_s11 }
 0xd4b   :  { %1282 = vrot.lane.b32.xlu1 %v1267_v3, %s3163_s14 }
 0xdb9   :  { %v1271_v6 = vpop.permute.xlu1 %1270 }
 0xdba   :  { %v1273_v4 = vmul.f32 %v3003_v50, %v1271_v6 }
 0xdbc   :  { %1277 = vrot.lane.b32.xlu0 %v1273_v4, %s3166_s1 }
 0xdbd   :  { %v1283_v7 = vpop.permute.xlu1 %1282 }
 0xdbe   :  { %v4077_v13 = vsel %vm1275_vm5, %v1283_v7, %v3941_v56 }
 0xdbf   :  { %1479 = vrot.lane.b32.xlu1 %v4077_v13, %s3160_s11 }
 0xe2e   :  { %v1278_v16 = vpop.permute.xlu0 %1277 }
 0xe2f   :  { %v4082_v18 = vsel %vm1275_vm5, %v1278_v16, %v3946_v36 }
 0xe30   :  { %v1426_v60 = vpack.c.bf16 %v4082_v18, %v4082_v18 }
 0xe32   :  { %2775 = vmatmul.mubr.msk.bf16.vlgmr.msra.gmra.mxu1 %vm265_vm10, %v1426_v60 }
 0xe33   :  { %2814 = vmatpush3.msra.mxu1 %v3788_v15  ;;  %2845 = vmatprep.mubr.msk.f32.mxu1 %vm3158_vm0, %v3156_v1 }
 0xe34   :  { %2815 = vmatprep.subr.mxu1 %v3156_v1 }
 0xe35   :  { %2816 = vmatpush3.msra.mxu1 %v3802_v19 }
 0xe36   :  { %2817 = vmatprep.subr.mxu1 %v3156_v1 }
 0xe37   :  { %2818 = vmatpush3.msra.mxu1 %v3806_v21 }
 0xe38   :  { %2819 = vmatprep.subr.mxu1 %v3156_v1 }
 0xe39   :  { %2820 = vmatpush3.msra.mxu1 %v3810_v23 }
 0xe3a   :  { %2821 = vmatprep.subr.mxu1 %v3156_v1 }
 0xe3b   :  { %2822 = vmatpush3.msra.mxu1 %v3814_v25 }
 0xe3c   :  { %2823 = vmatprep.subr.mxu1 %v3156_v1 }
 0xe3d   :  { %2824 = vmatpush3.msra.mxu1 %v3818_v27 }
 0xe3e   :  { %2825 = vmatprep.subr.mxu1 %v3156_v1 }
 0xe3f   :  { %2826 = vmatpush3.msra.mxu1 %v3822_v29 }
 0xe40   :  { %2827 = vmatprep.subr.mxu1 %v3156_v1 }
 0xe41   :  { %2828 = vmatpush3.msra.mxu1 %v3967_v44 }
 0xe42   :  { %2829 = vmatprep.subr.mxu1 %v3156_v1 }
 0xe43   :  { %2830 = vmatpush3.msra.mxu1 %v3971_v9 }
 0xe44   :  { %2831 = vmatprep.subr.mxu1 %v3156_v1 }
 0xe45   :  { %2832 = vmatpush3.msra.mxu1 %v3975_v17 }
 0xe46   :  { %2833 = vmatprep.subr.mxu1 %v3156_v1 }
 0xe47   :  { %2834 = vmatpush3.msra.mxu1 %v3979_v38 }
 0xe48   :  { %2835 = vmatprep.subr.mxu1 %v3156_v1 }
 0xe49   :  { %2836 = vmatpush3.msra.mxu1 %v3983_v2 }
 0xe4a   :  { %2837 = vmatprep.subr.mxu1 %v3156_v1 }
 0xe4b   :  { %2838 = vmatpush3.msra.mxu1 %v3987_v47 }
 0xe4c   :  { %2839 = vmatprep.subr.mxu1 %v3156_v1 }
 0xe4d   :  { %2840 = vmatpush3.msra.mxu1 %v3991_v41 }
 0xe4e   :  { %2841 = vmatprep.subr.mxu1 %v3156_v1 }
 0xe4f   :  { %2842 = vmatpush3.msra.mxu1 %v3995_v0 }
 0xe50   :  { %2843 = vmatprep.subr.mxu1 %v3156_v1 }
 0xe51   :  { %2844 = vmatpush3.msra.mxu1 %v3999_v58 }
 0xe52   :  { %2846 = vmatmul.mubr.msk.f32.vlgmr.msra.gmra.mxu1 %vm359_vm3, %v3159_v40  ;;  %2856 = vmatprep.subr.mxu1 %v3156_v1 }
 0xe53   :  { %2857 = vmatpush3.msra.mxu1 %v3848_v20  ;;  %2888 = vmatprep.mubr.msk.f32.mxu1 %vm3158_vm0, %v3156_v1 }
 0xe54   :  { %2858 = vmatprep.subr.mxu1 %v3156_v1 }
 0xe55   :  { %2859 = vmatpush3.msra.mxu1 %v3854_v22 }
 0xe56   :  { %2860 = vmatprep.subr.mxu1 %v3156_v1 }
 0xe57   :  { %2861 = vmatpush3.msra.mxu1 %v3858_v24 }
 0xe58   :  { %2862 = vmatprep.subr.mxu1 %v3156_v1 }
 0xe59   :  { %2863 = vmatpush3.msra.mxu1 %v3862_v26 }
 0xe5a   :  { %2864 = vmatprep.subr.mxu1 %v3156_v1 }
 0xe5b   :  { %2865 = vmatpush3.msra.mxu1 %v3866_v28 }
 0xe5c   :  { %2866 = vmatprep.subr.mxu1 %v3156_v1 }
 0xe5d   :  { %2867 = vmatpush3.msra.mxu1 %v3870_v30 }
 0xe5e   :  { %2868 = vmatprep.subr.mxu1 %v3156_v1 }
 0xe5f   :  { %2869 = vmatpush3.msra.mxu1 %v3874_v31 }
 0xe60   :  { %2870 = vmatprep.subr.mxu1 %v3156_v1 }
 0xe61   :  { %2871 = vmatpush3.msra.mxu1 %v3878_v32 }
 0xe62   :  { %2872 = vmatprep.subr.mxu1 %v3156_v1 }
 0xe63   :  { %2873 = vmatpush3.msra.mxu1 %v3882_v33 }
 0xe64   :  { %2874 = vmatprep.subr.mxu1 %v3156_v1 }
 0xe65   :  { %2875 = vmatpush3.msra.mxu1 %v3886_v34 }
 0xe66   :  { %2876 = vmatprep.subr.mxu1 %v3156_v1 }
 0xe67   :  { %2877 = vmatpush3.msra.mxu1 %v3890_v35 }
 0xe68   :  { %2878 = vmatprep.subr.mxu1 %v3156_v1 }
 0xe69   :  { %2879 = vmatpush3.msra.mxu1 %v3894_v51 }
 0xe6a   :  { %2880 = vmatprep.subr.mxu1 %v3156_v1 }
 0xe6b   :  { %2881 = vmatpush3.msra.mxu1 %v3898_v48 }
 0xe6c   :  { %2882 = vmatprep.subr.mxu1 %v3156_v1 }
 0xe6d   :  { %2883 = vmatpush3.msra.mxu1 %v3902_v61 }
 0xe6e   :  { %2884 = vmatprep.subr.mxu1 %v3156_v1 }
 0xe6f   :  { %2885 = vmatpush3.msra.mxu1 %v3906_v12  ;;  %v1480_v12 = vpop.permute.xlu1 %1479 }
 0xe70   :  { %2886 = vmatprep.subr.mxu1 %v3156_v1 }
 0xe71   :  { %2887 = vmatpush3.msra.mxu1 %v3910_v14 }
 0xe72   :  { %2889 = vmatmul.mubr.msk.f32.vlgmr.msra.gmra.mxu1 %vm72_vm2, %v3159_v40  ;;  %2926 = vmatprep.subr.bf16.mxu1 %v3156_v1 }
 0xe73   :  { %2927 = vmatpush3.bf16.msra.mxu1 %v4048_v46  ;;  %2930 = vmatprep.mubr.msk.bf16.mxu1 %vm3158_vm0, %v3156_v1 }
 0xe74   :  { %2928 = vmatprep.subr.bf16.mxu1 %v3156_v1 }
 0xe77   :  { %2929 = vmatpush3.bf16.msra.mxu1 %v4057_v59 }
 0xef2   :  { %v1464_v57 = vpop.f32.mrf.mxu1 }
 0xef3   :  { %v1470_v20 = vadd.f32 %v1464_v57, %v1423_v45 }
 0xef4   :  { %v2776_v22 = vpop.f32.mrf.mxu1 }
 0xef5   :  { %3006 = vtanh.f32 %v1470_v20  ;;  %v2005_v33 = vmul.f32 -1.442695, %v1470_v20 }
 0xef6   :  { %v1467_v42 = vpop.f32.mrf.mxu1 }
 0xef7   :  { %3008 = vpow2.f32 %v2005_v33 }
 0xef8   :  { %v2777_v24 = vpop.f32.mrf.mxu1 }
 0xf02   :  { %v3007_v26 = vpop.eup %3006 }
 0xf03   :  { %1484 = vrot.lane.b32.xlu0 %v3007_v26, %s3160_s11 }
 0xf04   :  { %v3009_v34 = vpop.eup %3008 }
 0xf05   :  { %v1474_v35 = vadd.f32 1.0, %v3009_v34 }
 0xf07   :  { %3010 = vrcp.f32 %v1474_v35 }
 0xf12   :  { %v4171_v28 = vpop.f32.mrf.mxu1 }
 0xf13   :  { %v1648_v52 = vadd.f32 %v4171_v28, %v4066_v11 }
 0xf14   :  { %v2847_v30 = vpop.f32.mrf.mxu1  ;;  %v3011_v51 = vpop.eup %3010 }
 0xf15   :  { %v1482_v14 = vmul.f32 %v3011_v51, %v1480_v12 }
 0xf32   :  { %v4173_v31 = vpop.f32.mrf.mxu1 }
 0xf34   :  { %v2890_v32 = vpop.f32.mrf.mxu1 }
 0xf75   :  { %v1485_v48 = vpop.permute.xlu0 %1484 }
 0xf76   :  { %v1487_v61 = vmul.f32 %v3011_v51, %v1485_v48 }
 0xf78   :  { %1489 = vrot.lane.b32.xlu0 %v1487_v61, %s3160_s11  ;;  %v4270_v61 = vmov 0  }
 0xf79   :  { %v1949_v12 = vsel %vm67_vm4, 7, %v4270_v61 }
 0xfea   :  { %v1490_v54 = vpop.permute.xlu0 %1489 }
 0xfeb   :  { %v1492_v56 = vadd.f32 %v1490_v54, %v1482_v14 }
 0xfed   :  { %3012 = vtanh.f32 %v1492_v56 }
 0xffa   :  { %v3013_v36 = vpop.eup %3012 }
 0xffb   :  { %1495 = vrot.lane.b32.xlu1 %v3013_v36, %s3160_s11 }
 0xfff   :  { %1507 = vrot.lane.b32.xlu1 %v1492_v56, %s3163_s14 }
0x106d   :  { %v1496_v46 = vpop.permute.xlu1 %1495 }
0x106e   :  { %v1498_v59 = vmul.f32 %v3011_v51, %v1496_v46 }
0x1070   :  { %1502 = vrot.lane.b32.xlu0 %v1498_v59, %s3166_s1 }
0x1071   :  { %v1508_v5 = vpop.permute.xlu1 %1507 }
0x1072   :  { %v4183_v50 = vsel %vm1500_vm6, %v1508_v5, %v4077_v13 }
0x1073   :  { %1704 = vrot.lane.b32.xlu1 %v4183_v50, %s3160_s11 }
0x10e2   :  { %v1503_v49 = vpop.permute.xlu0 %1502 }
0x10e3   :  { %v4191_v63 = vsel %vm1500_vm6, %v1503_v49, %v4082_v18 }
0x10e4   :  { %v1651_v43 = vpack.c.bf16 %v4191_v63, %v4191_v63 }
0x10e6   :  { %2853 = vmatmul.mubr.msk.bf16.vlgmr.msra.gmra.mxu0 %vm265_vm10, %v1651_v43 }
0x10e7   :  { %2892 = vmatpush3.msra.mxu0 %v3788_v15  ;;  %2923 = vmatprep.mubr.msk.f32.mxu0 %vm3158_vm0, %v3156_v1  ;;  %vm1725_vm0 = vcmp.lt.s32.totalorder %v1724_v62, %v3491_v53 }
0x10e8   :  { %2893 = vmatprep.subr.mxu0 %v3156_v1 }
0x10e9   :  { %2894 = vmatpush3.msra.mxu0 %v3802_v19 }
0x10ea   :  { %2895 = vmatprep.subr.mxu0 %v3156_v1 }
0x10eb   :  { %2896 = vmatpush3.msra.mxu0 %v3806_v21 }
0x10ec   :  { %2897 = vmatprep.subr.mxu0 %v3156_v1 }
0x10ed   :  { %2898 = vmatpush3.msra.mxu0 %v3810_v23 }
0x10ee   :  { %2899 = vmatprep.subr.mxu0 %v3156_v1 }
0x10ef   :  { %2900 = vmatpush3.msra.mxu0 %v3814_v25 }
0x10f0   :  { %2901 = vmatprep.subr.mxu0 %v3156_v1 }
0x10f1   :  { %2902 = vmatpush3.msra.mxu0 %v3818_v27 }
0x10f2   :  { %2903 = vmatprep.subr.mxu0 %v3156_v1 }
0x10f3   :  { %2904 = vmatpush3.msra.mxu0 %v3822_v29 }
0x10f4   :  { %2905 = vmatprep.subr.mxu0 %v3156_v1 }
0x10f5   :  { %2906 = vmatpush3.msra.mxu0 %v3967_v44 }
0x10f6   :  { %2907 = vmatprep.subr.mxu0 %v3156_v1 }
0x10f7   :  { %2908 = vmatpush3.msra.mxu0 %v3971_v9 }
0x10f8   :  { %2909 = vmatprep.subr.mxu0 %v3156_v1 }
0x10f9   :  { %2910 = vmatpush3.msra.mxu0 %v3975_v17 }
0x10fa   :  { %2911 = vmatprep.subr.mxu0 %v3156_v1 }
0x10fb   :  { %2912 = vmatpush3.msra.mxu0 %v3979_v38 }
0x10fc   :  { %2913 = vmatprep.subr.mxu0 %v3156_v1 }
0x10fd   :  { %2914 = vmatpush3.msra.mxu0 %v3983_v2  ;;  %v1705_v2 = vpop.permute.xlu1 %1704 }
0x10fe   :  { %2915 = vmatprep.subr.mxu0 %v3156_v1 }
0x10ff   :  { %2916 = vmatpush3.msra.mxu0 %v3987_v47 }
0x1100   :  { %2917 = vmatprep.subr.mxu0 %v3156_v1 }
0x1101   :  { %2918 = vmatpush3.msra.mxu0 %v3991_v41 }
0x1102   :  { %2919 = vmatprep.subr.mxu0 %v3156_v1 }
0x1103   :  { %2920 = vmatpush3.msra.mxu0 %v3995_v0 }
0x1104   :  { %2921 = vmatprep.subr.mxu0 %v3156_v1 }
0x1105   :  { %2922 = vmatpush3.msra.mxu0 %v3999_v58 }
0x1106   :  { %2924 = vmatmul.mubr.msk.f32.vlgmr.msra.gmra.mxu0 %vm94_vm1, %v3159_v40  ;;  %vm1950_vm1 = vcmp.lt.s32.totalorder %v1949_v12, %v3491_v53 }
0x11a6   :  { %v1689_v15 = vpop.f32.mrf.mxu0 }
0x11a7   :  { %v1695_v19 = vadd.f32 %v1689_v15, %v1648_v52 }
0x11a8   :  { %v2854_v21 = vpop.f32.mrf.mxu0 }
0x11a9   :  { %3014 = vtanh.f32 %v1695_v19  ;;  %v2009_v44 = vmul.f32 -1.442695, %v1695_v19 }
0x11aa   :  { %v1692_v23 = vpop.f32.mrf.mxu0 }
0x11ab   :  { %3016 = vpow2.f32 %v2009_v44 }
0x11ac   :  { %v2855_v25 = vpop.f32.mrf.mxu0 }
0x11b6   :  { %v3015_v27 = vpop.eup %3014 }
0x11b7   :  { %1709 = vrot.lane.b32.xlu0 %v3015_v27, %s3160_s11 }
0x11b8   :  { %v3017_v9 = vpop.eup %3016 }
0x11b9   :  { %v1699_v17 = vadd.f32 1.0, %v3017_v9 }
0x11bb   :  { %3018 = vrcp.f32 %v1699_v17 }
0x11c6   :  { %v1872_v1 = vpop.f32.mrf.mxu0 }
0x11c7   :  { %v1873_v13 = vadd.f32 %v1872_v1, %v4173_v31 }
0x11c8   :  { %v2925_v29 = vpop.f32.mrf.mxu0  ;;  %v3019_v39 = vpop.eup %3018 }
0x11c9   :  { %v1707_v47 = vmul.f32 %v3019_v39, %v1705_v2 }
0x1229   :  { %v1710_v40 = vpop.permute.xlu0 %1709 }
0x122a   :  { %v1712_v38 = vmul.f32 %v3019_v39, %v1710_v40 }
0x122c   :  { %1714 = vrot.lane.b32.xlu0 %v1712_v38, %s3160_s11 }
0x129e   :  { %v1715_v41 = vpop.permute.xlu0 %1714 }
0x129f   :  { %v1717_v0 = vadd.f32 %v1715_v41, %v1707_v47 }
0x12a1   :  { %3020 = vtanh.f32 %v1717_v0 }
0x12ae   :  { %v3021_v58 = vpop.eup %3020 }
0x12af   :  { %1720 = vrot.lane.b32.xlu1 %v3021_v58, %s3160_s11 }
0x12b3   :  { %1732 = vrot.lane.b32.xlu1 %v1717_v0, %s3163_s14 }
0x1321   :  { %v1721_v11 = vpop.permute.xlu1 %1720 }
0x1322   :  { %v1723_v3 = vmul.f32 %v3019_v39, %v1721_v11 }
0x1324   :  { %1727 = vrot.lane.b32.xlu0 %v1723_v3, %s3166_s1 }
0x1325   :  { %v1733_v8 = vpop.permute.xlu1 %1732 }
0x1326   :  { %v1735_v6 = vsel %vm1725_vm0, %v1733_v8, %v4183_v50 }
0x1327   :  { %1929 = vrot.lane.b32.xlu1 %v1735_v6, %s3160_s11 }
0x1396   :  { %v1728_v10 = vpop.permute.xlu0 %1727 }
0x1397   :  { %v1730_v4 = vsel %vm1725_vm0, %v1728_v10, %v4191_v63 }
0x1398   :  { %v1876_v7 = vpack.c.bf16 %v1730_v4, %v1730_v4 }
0x1399   :  { %v1930_v31 = vpop.permute.xlu1 %1929 }
0x139a   :  { %2931 = vmatmul.mubr.msk.bf16.vlgmr.msra.gmra.mxu1 %vm265_vm10, %v1876_v7 }
0x145a   :  { %v1914_v16 = vpop.f32.mrf.mxu1 }
0x145b   :  { %v1920_v18 = vadd.f32 %v1914_v16, %v1873_v13 }
0x145c   :  { %v2932_v60 = vpop.f32.mrf.mxu1 }
0x145d   :  { %3022 = vtanh.f32 %v1920_v18  ;;  %v2013_v22 = vmul.f32 -1.442695, %v1920_v18 }
0x145e   :  { %v1917_v45 = vpop.f32.mrf.mxu1 }
0x145f   :  { %3024 = vpow2.f32 %v2013_v22 }
0x1460   :  { %v2933_v57 = vpop.f32.mrf.mxu1 }
0x146a   :  { %v3023_v20 = vpop.eup %3022 }
0x146b   :  { %1934 = vrot.lane.b32.xlu0 %v3023_v20, %s3160_s11 }
0x146c   :  { %v3025_v42 = vpop.eup %3024 }
0x146d   :  { %v1924_v24 = vadd.f32 1.0, %v3025_v42 }
0x146f   :  { %3026 = vrcp.f32 %v1924_v24 }
0x147c   :  { %v3027_v26 = vpop.eup %3026 }
0x147d   :  { %v1932_v32 = vmul.f32 %v3027_v26, %v1930_v31 }
0x14dd   :  { %v1935_v28 = vpop.permute.xlu0 %1934 }
0x14de   :  { %v1937_v30 = vmul.f32 %v3027_v26, %v1935_v28 }
0x14e0   :  { %1939 = vrot.lane.b32.xlu0 %v1937_v30, %s3160_s11 }
0x1552   :  { %v1940_v33 = vpop.permute.xlu0 %1939 }
0x1553   :  { %v1942_v34 = vadd.f32 %v1940_v33, %v1932_v32 }
0x1555   :  { %3028 = vtanh.f32 %v1942_v34 }
0x1562   :  { %v3029_v35 = vpop.eup %3028 }
0x1563   :  { %1945 = vrot.lane.b32.xlu1 %v3029_v35, %s3160_s11 }
0x15d5   :  { %v1946_v51 = vpop.permute.xlu1 %1945 }
0x15d6   :  { %v1948_v48 = vmul.f32 %v3027_v26, %v1946_v51 }
0x15d8   :  { %1952 = vrot.lane.b32.xlu0 %v1948_v48, %s3166_s1 }
0x164a   :  { %v1953_v14 = vpop.permute.xlu0 %1952 }
0x164b   :  { %v1955_v54 = vsel %vm1950_vm1, %v1953_v14, %v1730_v4 }
0x164c   :  { %1956 = vst.msk [vmem:[#allocation8] sm:$0xff] %vm265_vm10, %v1955_v54 }
0x164d   :  { %3135 = shalt.err (!%p3132_p5)
}
0x164e   :  { %1966 = dma.vmem_to_hbm [thread:$0]  %s1964_s19, 128, %s4266_s5, [#allocation4]  }
0x164f   :  { %3148 = dma.done.wait [#allocation4], 128  }
0x1650   :  { %3149 = vsyncadd [#allocation4], 4294967168 }
0x1651   :  { %1970 = vsyncpa [#allocation3], 1 }
0x1652   :  { %1971 = vsyncpa [#allocation6], 1 }
0x1653   :  { %1972 = vsyncpa [#allocation4], 1 }

</bundles_post_ra>
